<compile_context>
chip_gen: v5e
topology: v5e:2x2
jax: 0.10.0
libtpu: 0.0.40
codegen_flags: <defaults>
</compile_context>

<pallas_src>
import functools
import math

import jax
import jax.numpy as jnp
from jax.experimental import pallas as pl
from jax.experimental.pallas import tpu as pltpu


def _conv_bn_relu_kernel(x_ref, w_ref, shift_ref, o_ref, *, k, th, wo, cout,
                         transposed_out):
    # x_ref:     (Hp, Wo, k*Cin)    bf16 kx-packed padded input, one batch element
    # w_ref:     (k, k*Cin, Cout_p) bf16 weights with BN scale folded in (grid-resident)
    # shift_ref: (1, Cout_p)        f32 folded BN shift = beta - mean * scale
    # o_ref:     (Cout, th*wo) bf16 if transposed_out else (th*wo, Cout) bf16
    kcin = x_ref.shape[-1]
    i = pl.program_id(1)
    row0 = i * th
    if th % 8 == 0:
        row0 = pl.multiple_of(row0, 8)

    acc = None
    for ky in range(k):                                   # k is small & static -> unrolled
        # Leading-dim (H) slice: never touches the sublane/lane axes, so no relayout.
        rows = x_ref[pl.ds(row0 + ky, th), :, :]          # (th, Wo, k*Cin)
        slab = rows.reshape(th * wo, kcin)                # layout-trivial flatten
        part = jnp.dot(slab, w_ref[ky], preferred_element_type=jnp.float32)
        acc = part if acc is None else acc + part         # f32 accumulation

    y = jnp.maximum(acc + shift_ref[...], 0.0)            # BN shift + ReLU(inplace=True)
    if transposed_out:
        # (th*wo, Cout_p) -> (Cout_p, th*wo): tile lands directly in NCHW order, stores
        # are lane-dense (th*wo % 128 == 0) and only the real Cout rows hit HBM.
        yt = jnp.transpose(y)
        o_ref[...] = yt[:cout, :].astype(o_ref.dtype)
    else:
        o_ref[...] = y[:, :cout].astype(o_ref.dtype)


def _pick_row_tile(ho, wo, batch, max_tile_rows=2048):
    """Tile height th (a divisor of ho).
       * th % (8 // gcd(wo, 8)) == 0 keeps (th*wo, C) blocks (8,128)-tileable,
       * th*wo as large as possible but <= max_tile_rows (amortize ~0.35us/grid step),
       * batch * (ho // th) >= 2 whenever possible so the v7x megacore can shard."""
    step = 8 // math.gcd(wo, 8)
    cands = [d for d in range(1, ho + 1)
             if ho % d == 0 and (d % step == 0 or d == ho)]

    def key(d):
        rows, tiles = d * wo, ho // d
        fits = rows <= max_tile_rows
        return (batch * tiles >= 2, fits, rows if fits else -rows)

    return max(cands, key=key)


def conv_basic_forward(x_nchw, weight_oihw, gamma, beta, running_mean,
                       running_var, *, k=3, s=1, p=1, eps=1e-5,
                       compute_dtype=jnp.bfloat16, out_dtype=jnp.bfloat16):
    """Forward of ConvBasic (inference-form BN). x: (N, Cin, H, W); returns NCHW."""
    assert s == 1, "only stride 1 implemented (module default)"
    n, cin, h, w = x_nchw.shape
    cout = weight_oihw.shape[0]
    ho = (h + 2 * p - k) // s + 1
    wo = (w + 2 * p - k) // s + 1
    hp = h + 2 * p
    kcin = k * cin
    cout_p = ((cout + 127) // 128) * 128      # matmul N padded; never written to HBM

    # ---- host/XLA-side prep (single fused passes; see halo-tiling TODO above) ----------
    x_nhwc = jnp.transpose(x_nchw, (0, 2, 3, 1)).astype(compute_dtype)
    x_pad = jnp.pad(x_nhwc, ((0, 0), (p, p), (p, p), (0, 0)))          # (N, Hp, Wp, Cin)
    # kx-packed layout: x_packed[b, y, x, kx*Cin + ci] == x_pad[b, y, x + kx, ci]
    x_packed = jnp.concatenate([x_pad[:, :, kx:kx + wo, :] for kx in range(k)],
                               axis=-1)                                 # (N, Hp, Wo, k*Cin)

    scale = gamma / jnp.sqrt(running_var + eps)                         # (Cout,)
    shift = beta - running_mean * scale                                 # (Cout,)
    # weights -> (ky, kx*Cin + ci, Cout_p), BN scale folded into the output columns (f32)
    w_t = jnp.transpose(weight_oihw, (2, 3, 1, 0)) * scale              # (k, k, Cin, Cout)
    w_mat = w_t.reshape(k, kcin, cout)
    w_mat = jnp.pad(w_mat, ((0, 0), (0, 0), (0, cout_p - cout))).astype(compute_dtype)
    shift2d = jnp.pad(shift, (0, cout_p - cout)).reshape(1, cout_p).astype(jnp.float32)

    th = _pick_row_tile(ho, wo, n)
    n_row_tiles = ho // th
    tile_rows = th * wo
    transposed_out = (tile_rows % 128 == 0)   # kernel can emit NCHW-ordered tiles directly

    # ---- VMEM budget (generation aware) -------------------------------------------------
    bpe = jnp.dtype(compute_dtype).itemsize
    obe = jnp.dtype(out_dtype).itemsize
    vmem_est = (
        2 * hp * wo * kcin * bpe                              # packed image, double-buffered
        + 1 * k * kcin * cout_p * bpe                         # weights (Buffered(1))
        + 1 * cout_p * 4                                      # BN shift (Buffered(1))
        + 2 * tile_rows * cout * obe                          # output tiles, double-buffered
        + tile_rows * cout_p * 4                              # f32 accumulator
        + (tile_rows * cout_p * 4 if transposed_out else 0)   # transposed copy
        + 2 * tile_rows * kcin * bpe)                         # live im2col slabs
    try:
        vmem_cap = int(pltpu.get_tpu_info().vmem_capacity_bytes)
    except Exception:                         # be generation-safe if the query is absent
        vmem_cap = 64 * 1024 * 1024           # v7x has the smallest VMEM (64 MiB / TC)
    vmem_limit = int(min(max(int(1.5 * vmem_est), 16 * 1024 * 1024),
                         int(0.85 * vmem_cap)))

    def _call(use_buffered, transposed):
        if transposed:
            oshape = jax.ShapeDtypeStruct((n, cout, ho * wo), out_dtype)
            ospec = pl.BlockSpec((None, cout, tile_rows), lambda b, i: (b, 0, i))
        else:
            oshape = jax.ShapeDtypeStruct((n, ho * wo, cout), out_dtype)
            ospec = pl.BlockSpec((None, tile_rows, cout), lambda b, i: (b, i, 0))
        buf = dict(pipeline_mode=pl.Buffered(1)) if use_buffered else {}
        return pl.pallas_call(
            functools.partial(_conv_bn_relu_kernel, k=k, th=th, wo=wo, cout=cout,
                              transposed_out=transposed),
            out_shape=oshape,
            grid_spec=pltpu.PrefetchScalarGridSpec(
                num_scalar_prefetch=0,
                grid=(n, n_row_tiles),
                in_specs=[
                    # whole kx-packed image: one DMA per batch element, resident over tiles
                    pl.BlockSpec((None, hp, wo, kcin), lambda b, i: (b, 0, 0, 0)),
                    # grid-invariant operands: single-buffered (no pointless second copy)
                    pl.BlockSpec((k, kcin, cout_p), lambda b, i: (0, 0, 0), **buf),
                    pl.BlockSpec((1, cout_p), lambda b, i: (0, 0), **buf),
                ],
                out_specs=ospec),
            compiler_params=pltpu.CompilerParams(
                dimension_semantics=("parallel", "parallel"),
                vmem_limit_bytes=vmem_limit),
        )(x_packed, w_mat, shift2d)

    try:
        out_flat, transposed_used = _call(True, transposed_out), transposed_out
    except Exception:
        # Conservative retry (older JAX: no pipeline_mode / in-kernel transpose support).
        out_flat, transposed_used = _call(False, False), False

    if transposed_used:
        return out_flat.reshape(n, cout, ho, wo)              # already NCHW order
    out = out_flat.reshape(n, ho, wo, cout)
    return jnp.transpose(out, (0, 3, 1, 2))


def _reference(x_nchw, w_folded, shift, *, k=3, s=1, p=1):
    y = jax.lax.conv_general_dilated(
        x_nchw, w_folded, window_strides=(s, s), padding=[(p, p), (p, p)],
        dimension_numbers=("NCHW", "OIHW", "NCHW"))
    return jnp.maximum(y + shift.reshape(1, -1, 1, 1), 0.0)


if __name__ == "__main__":
    key = jax.random.PRNGKey(0)
    n, cin, cout, h, w, k, s, p = 2, 4, 8, 16, 16, 3, 1, 1

    k_x, k_w, k_g, k_b, k_m, k_v = jax.random.split(key, 6)
    x = jax.random.normal(k_x, (n, cin, h, w), jnp.float32)
    weight = jax.random.normal(k_w, (cout, cin, k, k), jnp.float32) * 0.1
    gamma = 1.0 + 0.1 * jax.random.normal(k_g, (cout,), jnp.float32)
    beta = 0.1 * jax.random.normal(k_b, (cout,), jnp.float32)
    running_mean = 0.1 * jax.random.normal(k_m, (cout,), jnp.float32)
    running_var = jnp.abs(jax.random.normal(k_v, (cout,), jnp.float32)) + 0.5

    out = conv_basic_forward(x, weight, gamma, beta, running_mean,
                             running_var, k=k, s=s, p=p)
    out = jax.block_until_ready(out)
    assert out.shape == (n, cout, h, w)

    # Reference with the kernel's numerics: bf16-rounded activations, scale-folded
    # bf16-rounded weights, f32 accumulation, f32 shift + ReLU.
    eps = 1e-5
    scale = gamma / jnp.sqrt(running_var + eps)
    shift = beta - running_mean * scale
    x_b = x.astype(jnp.bfloat16).astype(jnp.float32)
    w_fold = (weight * scale.reshape(-1, 1, 1, 1)).astype(jnp.bfloat16).astype(jnp.float32)
    ref = _reference(x_b, w_fold, shift, k=k, s=s, p=p)

    assert jnp.allclose(out.astype(jnp.float32), ref, atol=2e-2, rtol=2e-2), \
        "mismatch vs reference"
    print("KERNEL_OK")
</pallas_src>

<mosaic_0001>
module attributes {stable_mosaic.version = 11 : i64} {
  func.func @_conv_bn_relu_kernel(%arg0: i32, %arg1: i32, %arg2: memref<1x18x16x12xbf16, #tpu.memory_space<vmem>>, %arg3: memref<3x12x128xbf16, #tpu.memory_space<vmem>>, %arg4: memref<1x128xf32, #tpu.memory_space<vmem>>, %arg5: memref<1x8x256xbf16, #tpu.memory_space<vmem>>) attributes {dimension_semantics = [#tpu.dimension_semantics<parallel>, #tpu.dimension_semantics<parallel>], iteration_bounds = array<i64: 2, 1>, scalar_prefetch = 0 : i64, scratch_operands = 0 : i64, tpu.core_type = #tpu.core_type<tc>, window_params = [{transform_indices = @transform_0, window_bounds = array<i64: 1, 18, 16, 12>}, {pipeline_mode = #tpu.pipeline_mode<synchronous>, transform_indices = @transform_1, window_bounds = array<i64: 3, 12, 128>}, {pipeline_mode = #tpu.pipeline_mode<synchronous>, transform_indices = @transform_2, window_bounds = array<i64: 1, 128>}, {transform_indices = @transform_3, window_bounds = array<i64: 1, 8, 256>}]} {
    %c16_i32 = arith.constant 16 : i32
    %0 = arith.muli %arg1, %c16_i32 : i32
    %1 = tpu.assume_multiple %0, 8 : i32
    %c0_i32 = arith.constant 0 : i32
    %2 = arith.addi %1, %c0_i32 : i32
    %c0 = arith.constant 0 : index
    %3 = arith.index_cast %2 : i32 to index
    %c0_0 = arith.constant 0 : index
    %c0_1 = arith.constant 0 : index
    %4 = vector.load %arg2[%c0, %3, %c0_0, %c0_1] : memref<1x18x16x12xbf16, #tpu.memory_space<vmem>>, vector<1x16x16x12xbf16>
    %5 = vector.shape_cast %4 : vector<1x16x16x12xbf16> to vector<16x16x12xbf16>
    %6 = vector.shape_cast %5 : vector<16x16x12xbf16> to vector<256x12xbf16>
    %c0_2 = arith.constant 0 : index
    %c0_3 = arith.constant 0 : index
    %c0_4 = arith.constant 0 : index
    %7 = vector.load %arg3[%c0_2, %c0_3, %c0_4] : memref<3x12x128xbf16, #tpu.memory_space<vmem>>, vector<1x12x128xbf16>
    %8 = vector.shape_cast %7 : vector<1x12x128xbf16> to vector<12x128xbf16>
    %cst = arith.constant dense<0.000000e+00> : vector<256x128xf32>
    %9 = tpu.matmul %6, %8, %cst {dimension_numbers = #tpu.dot_dimension_numbers<[1], [0], [0], [1], [0, 0, 1, 1], [], []>} : vector<256x12xbf16>, vector<12x128xbf16>, vector<256x128xf32> -> vector<256x128xf32>
    %c1_i32 = arith.constant 1 : i32
    %10 = arith.addi %1, %c1_i32 : i32
    %c0_5 = arith.constant 0 : index
    %11 = arith.index_cast %10 : i32 to index
    %c0_6 = arith.constant 0 : index
    %c0_7 = arith.constant 0 : index
    %12 = vector.load %arg2[%c0_5, %11, %c0_6, %c0_7] : memref<1x18x16x12xbf16, #tpu.memory_space<vmem>>, vector<1x16x16x12xbf16>
    %13 = vector.shape_cast %12 : vector<1x16x16x12xbf16> to vector<16x16x12xbf16>
    %14 = vector.shape_cast %13 : vector<16x16x12xbf16> to vector<256x12xbf16>
    %c1 = arith.constant 1 : index
    %c0_8 = arith.constant 0 : index
    %c0_9 = arith.constant 0 : index
    %15 = vector.load %arg3[%c1, %c0_8, %c0_9] : memref<3x12x128xbf16, #tpu.memory_space<vmem>>, vector<1x12x128xbf16>
    %16 = vector.shape_cast %15 : vector<1x12x128xbf16> to vector<12x128xbf16>
    %cst_10 = arith.constant dense<0.000000e+00> : vector<256x128xf32>
    %17 = tpu.matmul %14, %16, %cst_10 {dimension_numbers = #tpu.dot_dimension_numbers<[1], [0], [0], [1], [0, 0, 1, 1], [], []>} : vector<256x12xbf16>, vector<12x128xbf16>, vector<256x128xf32> -> vector<256x128xf32>
    %18 = arith.addf %9, %17 : vector<256x128xf32>
    %c2_i32 = arith.constant 2 : i32
    %19 = arith.addi %1, %c2_i32 : i32
    %c0_11 = arith.constant 0 : index
    %20 = arith.index_cast %19 : i32 to index
    %c0_12 = arith.constant 0 : index
    %c0_13 = arith.constant 0 : index
    %21 = vector.load %arg2[%c0_11, %20, %c0_12, %c0_13] : memref<1x18x16x12xbf16, #tpu.memory_space<vmem>>, vector<1x16x16x12xbf16>
    %22 = vector.shape_cast %21 : vector<1x16x16x12xbf16> to vector<16x16x12xbf16>
    %23 = vector.shape_cast %22 : vector<16x16x12xbf16> to vector<256x12xbf16>
    %c2 = arith.constant 2 : index
    %c0_14 = arith.constant 0 : index
    %c0_15 = arith.constant 0 : index
    %24 = vector.load %arg3[%c2, %c0_14, %c0_15] : memref<3x12x128xbf16, #tpu.memory_space<vmem>>, vector<1x12x128xbf16>
    %25 = vector.shape_cast %24 : vector<1x12x128xbf16> to vector<12x128xbf16>
    %cst_16 = arith.constant dense<0.000000e+00> : vector<256x128xf32>
    %26 = tpu.matmul %23, %25, %cst_16 {dimension_numbers = #tpu.dot_dimension_numbers<[1], [0], [0], [1], [0, 0, 1, 1], [], []>} : vector<256x12xbf16>, vector<12x128xbf16>, vector<256x128xf32> -> vector<256x128xf32>
    %27 = arith.addf %18, %26 : vector<256x128xf32>
    %c0_17 = arith.constant 0 : index
    %c0_18 = arith.constant 0 : index
    %28 = vector.load %arg4[%c0_17, %c0_18] : memref<1x128xf32, #tpu.memory_space<vmem>>, vector<1x128xf32>
    %29 = vector.broadcast %28 : vector<1x128xf32> to vector<256x128xf32>
    %30 = arith.addf %27, %29 : vector<256x128xf32>
    %cst_19 = arith.constant 0.000000e+00 : f32
    %31 = vector.broadcast %cst_19 : f32 to vector<256x128xf32>
    %32 = arith.maximumf %30, %31 : vector<256x128xf32>
    %33 = tpu.transpose %32, [1, 0] : vector<256x128xf32> -> vector<128x256xf32>
    %34 = vector.extract_strided_slice %33 {offsets = [0, 0], sizes = [8, 256], strides = [1, 1]} : vector<128x256xf32> to vector<8x256xf32>
    %35 = arith.truncf %34 : vector<8x256xf32> to vector<8x256xbf16>
    %c0_20 = arith.constant 0 : index
    %c0_21 = arith.constant 0 : index
    %c0_22 = arith.constant 0 : index
    %36 = vector.load %arg5[%c0_20, %c0_21, %c0_22] : memref<1x8x256xbf16, #tpu.memory_space<vmem>>, vector<1x8x256xbf16>
    %37 = vector.shape_cast %36 : vector<1x8x256xbf16> to vector<8x256xbf16>
    %38 = vector.shape_cast %35 : vector<8x256xbf16> to vector<1x8x256xbf16>
    tpu.vector_store %arg5[%c0_20, %c0_21, %c0_22], %38 {strides = array<i32>} : memref<1x8x256xbf16, #tpu.memory_space<vmem>>, vector<1x8x256xbf16>,
    return
  }
  func.func @transform_0(%arg0: i32, %arg1: i32) -> (i32, i32, i32, i32) {
    %c0_i32 = arith.constant 0 : i32
    %c0_i32_0 = arith.constant 0 : i32
    %c0_i32_1 = arith.constant 0 : i32
    %c0_i32_2 = arith.constant 0 : i32
    return %arg0, %c0_i32, %c0_i32_0, %c0_i32_1 : i32, i32, i32, i32
  }
  func.func @transform_1(%arg0: i32, %arg1: i32) -> (i32, i32, i32) {
    %c0_i32 = arith.constant 0 : i32
    %c0_i32_0 = arith.constant 0 : i32
    %c0_i32_1 = arith.constant 0 : i32
    %c0_i32_2 = arith.constant 0 : i32
    return %c0_i32, %c0_i32_0, %c0_i32_1 : i32, i32, i32
  }
  func.func @transform_2(%arg0: i32, %arg1: i32) -> (i32, i32) {
    %c0_i32 = arith.constant 0 : i32
    %c0_i32_0 = arith.constant 0 : i32
    %c0_i32_1 = arith.constant 0 : i32
    return %c0_i32, %c0_i32_0 : i32, i32
  }
  func.func @transform_3(%arg0: i32, %arg1: i32) -> (i32, i32, i32) {
    %c0_i32 = arith.constant 0 : i32
    %c0_i32_0 = arith.constant 0 : i32
    return %arg0, %c0_i32, %arg1 : i32, i32, i32
  }
}

module attributes {stable_mosaic.version = 11 : i64} {
  func.func @_conv_bn_relu_kernel(%arg0: i32, %arg1: i32, %arg2: memref<1x18x16x12xbf16, #tpu.memory_space<vmem>>, %arg3: memref<3x12x128xbf16, #tpu.memory_space<vmem>>, %arg4: memref<1x128xf32, #tpu.memory_space<vmem>>, %arg5: memref<1x256x8xbf16, #tpu.memory_space<vmem>>) attributes {dimension_semantics = [#tpu.dimension_semantics<parallel>, #tpu.dimension_semantics<parallel>], iteration_bounds = array<i64: 2, 1>, scalar_prefetch = 0 : i64, scratch_operands = 0 : i64, tpu.core_type = #tpu.core_type<tc>, window_params = [{transform_indices = @transform_0, window_bounds = array<i64: 1, 18, 16, 12>}, {pipeline_mode = #tpu.pipeline_mode<synchronous>, transform_indices = @transform_1, window_bounds = array<i64: 3, 12, 128>}, {pipeline_mode = #tpu.pipeline_mode<synchronous>, transform_indices = @transform_2, window_bounds = array<i64: 1, 128>}, {transform_indices = @transform_3, window_bounds = array<i64: 1, 256, 8>}]} {
    %c16_i32 = arith.constant 16 : i32
    %0 = arith.muli %arg1, %c16_i32 : i32
    %1 = tpu.assume_multiple %0, 8 : i32
    %c0_i32 = arith.constant 0 : i32
    %2 = arith.addi %1, %c0_i32 : i32
    %c0 = arith.constant 0 : index
    %3 = arith.index_cast %2 : i32 to index
    %c0_0 = arith.constant 0 : index
    %c0_1 = arith.constant 0 : index
    %4 = vector.load %arg2[%c0, %3, %c0_0, %c0_1] : memref<1x18x16x12xbf16, #tpu.memory_space<vmem>>, vector<1x16x16x12xbf16>
    %5 = vector.shape_cast %4 : vector<1x16x16x12xbf16> to vector<16x16x12xbf16>
    %6 = vector.shape_cast %5 : vector<16x16x12xbf16> to vector<256x12xbf16>
    %c0_2 = arith.constant 0 : index
    %c0_3 = arith.constant 0 : index
    %c0_4 = arith.constant 0 : index
    %7 = vector.load %arg3[%c0_2, %c0_3, %c0_4] : memref<3x12x128xbf16, #tpu.memory_space<vmem>>, vector<1x12x128xbf16>
    %8 = vector.shape_cast %7 : vector<1x12x128xbf16> to vector<12x128xbf16>
    %cst = arith.constant dense<0.000000e+00> : vector<256x128xf32>
    %9 = tpu.matmul %6, %8, %cst {dimension_numbers = #tpu.dot_dimension_numbers<[1], [0], [0], [1], [0, 0, 1, 1], [], []>} : vector<256x12xbf16>, vector<12x128xbf16>, vector<256x128xf32> -> vector<256x128xf32>
    %c1_i32 = arith.constant 1 : i32
    %10 = arith.addi %1, %c1_i32 : i32
    %c0_5 = arith.constant 0 : index
    %11 = arith.index_cast %10 : i32 to index
    %c0_6 = arith.constant 0 : index
    %c0_7 = arith.constant 0 : index
    %12 = vector.load %arg2[%c0_5, %11, %c0_6, %c0_7] : memref<1x18x16x12xbf16, #tpu.memory_space<vmem>>, vector<1x16x16x12xbf16>
    %13 = vector.shape_cast %12 : vector<1x16x16x12xbf16> to vector<16x16x12xbf16>
    %14 = vector.shape_cast %13 : vector<16x16x12xbf16> to vector<256x12xbf16>
    %c1 = arith.constant 1 : index
    %c0_8 = arith.constant 0 : index
    %c0_9 = arith.constant 0 : index
    %15 = vector.load %arg3[%c1, %c0_8, %c0_9] : memref<3x12x128xbf16, #tpu.memory_space<vmem>>, vector<1x12x128xbf16>
    %16 = vector.shape_cast %15 : vector<1x12x128xbf16> to vector<12x128xbf16>
    %cst_10 = arith.constant dense<0.000000e+00> : vector<256x128xf32>
    %17 = tpu.matmul %14, %16, %cst_10 {dimension_numbers = #tpu.dot_dimension_numbers<[1], [0], [0], [1], [0, 0, 1, 1], [], []>} : vector<256x12xbf16>, vector<12x128xbf16>, vector<256x128xf32> -> vector<256x128xf32>
    %18 = arith.addf %9, %17 : vector<256x128xf32>
    %c2_i32 = arith.constant 2 : i32
    %19 = arith.addi %1, %c2_i32 : i32
    %c0_11 = arith.constant 0 : index
    %20 = arith.index_cast %19 : i32 to index
    %c0_12 = arith.constant 0 : index
    %c0_13 = arith.constant 0 : index
    %21 = vector.load %arg2[%c0_11, %20, %c0_12, %c0_13] : memref<1x18x16x12xbf16, #tpu.memory_space<vmem>>, vector<1x16x16x12xbf16>
    %22 = vector.shape_cast %21 : vector<1x16x16x12xbf16> to vector<16x16x12xbf16>
    %23 = vector.shape_cast %22 : vector<16x16x12xbf16> to vector<256x12xbf16>
    %c2 = arith.constant 2 : index
    %c0_14 = arith.constant 0 : index
    %c0_15 = arith.constant 0 : index
    %24 = vector.load %arg3[%c2, %c0_14, %c0_15] : memref<3x12x128xbf16, #tpu.memory_space<vmem>>, vector<1x12x128xbf16>
    %25 = vector.shape_cast %24 : vector<1x12x128xbf16> to vector<12x128xbf16>
    %cst_16 = arith.constant dense<0.000000e+00> : vector<256x128xf32>
    %26 = tpu.matmul %23, %25, %cst_16 {dimension_numbers = #tpu.dot_dimension_numbers<[1], [0], [0], [1], [0, 0, 1, 1], [], []>} : vector<256x12xbf16>, vector<12x128xbf16>, vector<256x128xf32> -> vector<256x128xf32>
    %27 = arith.addf %18, %26 : vector<256x128xf32>
    %c0_17 = arith.constant 0 : index
    %c0_18 = arith.constant 0 : index
    %28 = vector.load %arg4[%c0_17, %c0_18] : memref<1x128xf32, #tpu.memory_space<vmem>>, vector<1x128xf32>
    %29 = vector.broadcast %28 : vector<1x128xf32> to vector<256x128xf32>
    %30 = arith.addf %27, %29 : vector<256x128xf32>
    %cst_19 = arith.constant 0.000000e+00 : f32
    %31 = vector.broadcast %cst_19 : f32 to vector<256x128xf32>
    %32 = arith.maximumf %30, %31 : vector<256x128xf32>
    %33 = vector.extract_strided_slice %32 {offsets = [0, 0], sizes = [256, 8], strides = [1, 1]} : vector<256x128xf32> to vector<256x8xf32>
    %34 = arith.truncf %33 : vector<256x8xf32> to vector<256x8xbf16>
    %c0_20 = arith.constant 0 : index
    %c0_21 = arith.constant 0 : index
    %c0_22 = arith.constant 0 : index
    %35 = vector.load %arg5[%c0_20, %c0_21, %c0_22] : memref<1x256x8xbf16, #tpu.memory_space<vmem>>, vector<1x256x8xbf16>
    %36 = vector.shape_cast %35 : vector<1x256x8xbf16> to vector<256x8xbf16>
    %37 = vector.shape_cast %34 : vector<256x8xbf16> to vector<1x256x8xbf16>
    tpu.vector_store %arg5[%c0_20, %c0_21, %c0_22], %37 {strides = array<i32>} : memref<1x256x8xbf16, #tpu.memory_space<vmem>>, vector<1x256x8xbf16>,
    return
  }
  func.func @transform_0(%arg0: i32, %arg1: i32) -> (i32, i32, i32, i32) {
    %c0_i32 = arith.constant 0 : i32
    %c0_i32_0 = arith.constant 0 : i32
    %c0_i32_1 = arith.constant 0 : i32
    %c0_i32_2 = arith.constant 0 : i32
    return %arg0, %c0_i32, %c0_i32_0, %c0_i32_1 : i32, i32, i32, i32
  }
  func.func @transform_1(%arg0: i32, %arg1: i32) -> (i32, i32, i32) {
    %c0_i32 = arith.constant 0 : i32
    %c0_i32_0 = arith.constant 0 : i32
    %c0_i32_1 = arith.constant 0 : i32
    %c0_i32_2 = arith.constant 0 : i32
    return %c0_i32, %c0_i32_0, %c0_i32_1 : i32, i32, i32
  }
  func.func @transform_2(%arg0: i32, %arg1: i32) -> (i32, i32) {
    %c0_i32 = arith.constant 0 : i32
    %c0_i32_0 = arith.constant 0 : i32
    %c0_i32_1 = arith.constant 0 : i32
    return %c0_i32, %c0_i32_0 : i32, i32
  }
  func.func @transform_3(%arg0: i32, %arg1: i32) -> (i32, i32, i32) {
    %c0_i32 = arith.constant 0 : i32
    %c0_i32_0 = arith.constant 0 : i32
    return %arg0, %arg1, %c0_i32 : i32, i32, i32
  }
}

</mosaic_0001>

<bundles_post_ra>
// kernel: tpu_custom_call.1
= control target key start
LH: loop header
LB: loop body
LE: loop exit
PB: predicated region body
PF: predicated region fallthrough
CT: control target
= control target key end

     0   :  { %8 = vsyncpa [#allocation3], 0  ;;  %s2173_s0 = inlined_call_operand.vmem [shape: bf16[2,18,16,12], index: 0, kind: input, shape index: {}]   ;;  %s2174_s1 = inlined_call_operand.vmem [shape: bf16[3,12,128], index: 1, kind: input, shape index: {}]   ;;  %s2175_s2 = inlined_call_operand.vmem [shape: f32[1,128], index: 2, kind: input, shape index: {}]   ;;  %s2176_s3 = inlined_call_operand.hbm [shape: bf16[2,8,256], index: 3, kind: output, shape index: {}]  }
   0x1   :  { %10 = vsyncpa [#allocation3 + $0x1], 0  ;;  %s1824_s12 = smov 0   ;;  %s1826_s13 = smov 0  }
   0x2   :  { %s1828_s14 = smov 0   ;;  %s1830_s15 = smov 0  }
   0x3   :  { %s1832_s16 = smov 0   ;;  %s1834_s17 = smov 0  }
   0x4 LB: > { %s1243_s18 = sadd.s32 4294967295, %s1802_s17   ;;  %s1244_s19 = sadd.s32 4294967294, %s1802_s17   ;;  %s1802_s17 = sphi %s1834_s17, %s16_s17   ;;  %s1798_s16 = sphi %s1832_s16, %s2183_s16   ;;  %s1794_s15 = sphi %s1830_s15, %s2182_s15   ;;  %s1790_s14 = sphi %s1828_s14, %s2181_s14   ;;  %s1786_s13 = sphi %s1826_s13, %s2180_s13   ;;  %s1782_s12 = sphi %s1824_s12, %s2179_s12  }
   0x5   : > { %s28_s20 = sadd.s32 1, %s1798_s16  ;;  %s105_s21 = sadd.s32 1, %s1790_s14 }
   0x6   : > { %p30_p0 = scmp.ge.s32.totalorder %s28_s20, 2  ;;  %p115_p1 = scmp.ne.s32.totalorder %s1790_s14, %s1786_s13 }
   0x7   : > { %p116_p2 = scmp.eq.s32.totalorder %s1243_s18, 1  ;;  %p121_p3 = scmp.ne.s32.totalorder %s1786_s13, %s1782_s12 }
   0x8   : > { %s2185_s20 = smov (%p30_p0, %s28_s20), 0  ;;  %p122_p5 = scmp.eq.s32.totalorder %s1244_s19, 1 }
   0x9   : > { %p1864_p4 = por %p116_p2, %p115_p1  ;;  %s100_s23 = ssub.s32 %s1798_s16, %s2185_s20 }
   0xa   : > { %p1247_p6 = scmp.ge.s32.totalorder %s1802_s17, 1  ;;  %p103_p7 = scmp.eq.s32.totalorder %s100_s23, 0 }
   0xb   : > { %p1871_p8 = por %p122_p5, %p121_p3  ;;  %p154_p9 = scmp.lt.s32.totalorder %s1802_s17, 3 }
   0xc   : > { %s1877_s25 = scalar_select %p103_p7, %s1790_s14, %s105_s21  }
   0xd   : > { %p155_p10 = pnand %p1247_p6, %p154_p9 }
   0xe   : > { %p178_p11 = scmp.lt.s32.totalorder (!%p155_p10), %s1794_s15, 1  ;;  %s175_s28 = sand.u32 (!%p155_p10), 1, %s1786_s13  }
   0xf   : > { %158 = sbr.rel (%p155_p10) target bundleno = 469 (0x1d5), region = 32  ;;  %s1248_s29 = sshll.u32 (!%p155_p10), %s175_s28, 3 }
  0x10   : > { %s1626_s30 = sshll.u32 (!%p155_p10), %s1794_s15, 3  ;;  %s177_s7 = scalar_lea.vmem (!%p155_p10), [#allocation2], %s1248_s29 }
  0x11   : > { %s1158_s6 = scalar_lea.hbm (!%p155_p10), %s2176_s3, %s1626_s30  ;;  %s1160_s8 = sshll.u32 (!%p155_p10), %s177_s7, 4  ;;  %s1161_s8 = int_to_ptr.vmem [resolvable:$true] %s1160_s8 }
  0x12   : > { %s1162_s9 = sshll.u32 (!%p155_p10), %s1158_s6, 4  ;;  %s1145_s10 = scalar_lea.sflag (!%p155_p10), [#allocation3], %s175_s28  ;;  %s1163_s9 = int_to_ptr.hbm [resolvable:$true] %s1162_s9 }
  0x13   : > { %s1744_s21 = scalar_lea.hbm (!%p155_p10), %s2176_s3, 16 }
  0x14   : > { %v1350_v0 = vld [vmem:[%s2174_s1 + $0x8] sm:$0xf]  ;;  %v1608_v1 = vld [vmem:[%s2174_s1 + $0x8] sm:$0x30]  ;;  %vm396_vm0 = vcmask 1045504   ;;  %s179_s11 = scalar_select %p178_p11, %s1794_s15, 1 }
  0x15   : > { %v1351_v2 = vor.u32 %v1608_v1, %v1350_v0  ;;  %v1434_v3 = vld [vmem:[%s2174_s1] sm:$0xf]  ;;  %v1591_v4 = vld [vmem:[%s2174_s1] sm:$0x30]  ;;  %v1552_v5 = vld [vmem:[%s2174_s1 + $0x10] sm:$0xf] }
  0x16   : > { %v1435_v6 = vor.u32 %v1591_v4, %v1434_v3  ;;  %v1625_v7 = vld [vmem:[%s2174_s1 + $0x10] sm:$0x30]  ;;  %s1630_s18 = smul.u32 144, %s179_s11  ;;  %vm347_vm1 = vcmask 97280   ;;  %s1738_s11 = sshra.s32 %s1163_s9, 4  ;;  %s1739_s11 = int_to_ptr.hbm [resolvable:$true] %s1738_s11 }
  0x17   : > { %v398_v8 = vsel %vm396_vm0, %v1351_v2, 0  ;;  %v1553_v9 = vor.u32 %v1625_v7, %v1552_v5  ;;  %p1745_p1 = scmp.lt.s32.totalorder %s1739_s11, %s2176_s3 }
  0x18   : > { %407 = vmatpush.bf16.msra.mxu0 %v398_v8  ;;  %1627 = vmatpush.bf16.msra.mxu3 %v398_v8  ;;  %v623_v10 = vsel %vm396_vm0, %v1435_v6, 0  ;;  %s1905_s23 = scalar_lea.vmem %s2173_s0, %s1630_s18  ;;  %s1740_s18 = scalar_lea.hbm %s1739_s11, 8 }
  0x19   : > { %632 = vmatpush.bf16.msra.mxu1 %v623_v10  ;;  %v887_v11 = vsel %vm396_vm0, %v1553_v9, 0  ;;  %v1592_v12 = vld [vmem:[%s1905_s23 + $0x8] sm:$0xff]  ;;  %v1575_v14 = vld [vmem:[%s1905_s23] sm:$0xff]  ;;  %v1609_v15 = vld [vmem:[%s1905_s23 + $0x10] sm:$0xff]  ;;  %p1741_p12 = scmp.ne.s32.totalorder %s1739_s11, %s1740_s18  ;;  %p1746_p2 = scmp.lt.s32.totalorder %s1744_s21, %s1740_s18 }
  0x1a   : > { %896 = vmatpush.bf16.msra.mxu2 %v887_v11  ;;  %v1604_v13 = vld [vmem:[%s1905_s23 + $0x68] sm:$0xff]  ;;  %v1593_v16 = vld [vmem:[%s1905_s23 + $0x10] sm:$0xff]  ;;  %v1610_v19 = vld [vmem:[%s1905_s23 + $0x18] sm:$0xff] }
  0x1b   : > { %1352 = vmatmul.msk.bf16.vlgmr.msra.gmra.mxu0 %vm347_vm1, %v1592_v12  ;;  %1364 = vmatmul.msk.bf16.vlgmr.msra.gmra.mxu3 %vm347_vm1, %v1604_v13  ;;  %v1605_v17 = vld [vmem:[%s1905_s23 + $0x70] sm:$0xff]  ;;  %v1576_v18 = vld [vmem:[%s1905_s23 + $0x8] sm:$0xff]  ;;  %v1594_v20 = vld [vmem:[%s1905_s23 + $0x18] sm:$0xff]  ;;  %p1742_p13 = pnand %p1741_p12, %p1864_p4  ;;  %p1747_p3 = por %p1746_p2, %p1745_p1 }
  0x1c   : > { %1628 = vmatpush.bf16.msrb.mxu3 %v623_v10  ;;  %1436 = vmatmul.msk.bf16.vlgmr.msra.gmra.mxu1 %vm347_vm1, %v1575_v14  ;;  %v1606_v21 = vld [vmem:[%s1905_s23 + $0x78] sm:$0xff]  ;;  %v1577_v22 = vld [vmem:[%s1905_s23 + $0x10] sm:$0xff]  ;;  %v1611_v23 = vld [vmem:[%s1905_s23 + $0x20] sm:$0xff] }
  0x1d   : > { %1554 = vmatmul.msk.bf16.vlgmr.msra.gmra.mxu2 %vm347_vm1, %v1609_v15  ;;  %v1595_v24 = vld [vmem:[%s1905_s23 + $0x20] sm:$0xff]  ;;  %v1578_v26 = vld [vmem:[%s1905_s23 + $0x18] sm:$0xff]  ;;  %v1612_v27 = vld [vmem:[%s1905_s23 + $0x28] sm:$0xff]  ;;  %p1743_p0 = pneg %p1742_p13 }
  0x1e   : > { %v1607_v25 = vld [vmem:[%s1905_s23 + $0x80] sm:$0xff]  ;;  %v1596_v28 = vld [vmem:[%s1905_s23 + $0x28] sm:$0xff]  ;;  %v1613_v31 = vld [vmem:[%s1905_s23 + $0x30] sm:$0xff] }
  0x1f   : > { %v1587_v29 = vld [vmem:[%s1905_s23 + $0x60] sm:$0xff]  ;;  %v1597_v32 = vld [vmem:[%s1905_s23 + $0x30] sm:$0xff]  ;;  %v1588_v33 = vld [vmem:[%s1905_s23 + $0x68] sm:$0xff]  ;;  %p1748_p5 = pnand %p1747_p3, %p1743_p0 }
  0x20   : > { %1629 = vmatpush.bf16.msra.mxu3 %v887_v11  ;;  %v1579_v30 = vld [vmem:[%s1905_s23 + $0x20] sm:$0xff]  ;;  %v1580_v34 = vld [vmem:[%s1905_s23 + $0x28] sm:$0xff]  ;;  %v1614_v35 = vld [vmem:[%s1905_s23 + $0x38] sm:$0xff] }
  0x21   : > { %v1598_v36 = vld [vmem:[%s1905_s23 + $0x38] sm:$0xff]  ;;  %v1589_v37 = vld [vmem:[%s1905_s23 + $0x70] sm:$0xff]  ;;  %v1615_v39 = vld [vmem:[%s1905_s23 + $0x40] sm:$0xff] }
  0x22   : > { %v1581_v38 = vld [vmem:[%s1905_s23 + $0x30] sm:$0xff]  ;;  %v1599_v40 = vld [vmem:[%s1905_s23 + $0x40] sm:$0xff]  ;;  %v1590_v41 = vld [vmem:[%s1905_s23 + $0x78] sm:$0xff] }
  0x23   : > { %v1582_v42 = vld [vmem:[%s1905_s23 + $0x38] sm:$0xff]  ;;  %v1616_v43 = vld [vmem:[%s1905_s23 + $0x48] sm:$0xff]  ;;  %v1621_v45 = vld [vmem:[%s1905_s23 + $0x70] sm:$0xff] }
  0x24   : > { %v1600_v44 = vld [vmem:[%s1905_s23 + $0x48] sm:$0xff]  ;;  %v1583_v47 = vld [vmem:[%s1905_s23 + $0x40] sm:$0xff]  ;;  %v1617_v48 = vld [vmem:[%s1905_s23 + $0x50] sm:$0xff] }
  0x25   : > { %v1601_v59 = vld [vmem:[%s1905_s23 + $0x50] sm:$0xff]  ;;  %v1622_v60 = vld [vmem:[%s1905_s23 + $0x78] sm:$0xff]  ;;  %v1584_v63 = vld [vmem:[%s1905_s23 + $0x48] sm:$0xff] }
  0x26   : > { %v1618_v0 = vld [vmem:[%s1905_s23 + $0x58] sm:$0xff]  ;;  %v1623_v12 = vld [vmem:[%s1905_s23 + $0x80] sm:$0xff]  ;;  %v1585_v15 = vld [vmem:[%s1905_s23 + $0x50] sm:$0xff] }
  0x27   : > { %v1602_v11 = vld [vmem:[%s1905_s23 + $0x58] sm:$0xff] }
  0x2b   : > { %1353 = vmatmul.msk.bf16.gmra.mxu0 %vm347_vm1, %v1593_v16  ;;  %1365 = vmatmul.msk.bf16.gmra.mxu3 %vm347_vm1, %v1605_v17  ;;  %v1619_v16 = vld [vmem:[%s1905_s23 + $0x60] sm:$0xff] }
  0x2c   : > { %1437 = vmatmul.msk.bf16.gmra.mxu1 %vm347_vm1, %v1576_v18 }
  0x2d   : > { %1555 = vmatmul.msk.bf16.gmra.mxu2 %vm347_vm1, %v1610_v19 }
  0x3b   : > { %1354 = vmatmul.msk.bf16.gmra.mxu0 %vm347_vm1, %v1594_v20  ;;  %1366 = vmatmul.msk.bf16.gmra.mxu3 %vm347_vm1, %v1606_v21 }
  0x3c   : > { %1438 = vmatmul.msk.bf16.gmra.mxu1 %vm347_vm1, %v1577_v22 }
  0x3d   : > { %1556 = vmatmul.msk.bf16.gmra.mxu2 %vm347_vm1, %v1611_v23 }
  0x4b   : > { %1355 = vmatmul.msk.bf16.gmra.mxu0 %vm347_vm1, %v1595_v24  ;;  %1367 = vmatmul.msk.bf16.gmra.mxu3 %vm347_vm1, %v1607_v25 }
  0x4c   : > { %1439 = vmatmul.msk.bf16.gmra.mxu1 %vm347_vm1, %v1578_v26 }
  0x4d   : > { %1557 = vmatmul.msk.bf16.gmra.mxu2 %vm347_vm1, %v1612_v27  ;;  %v1603_v27 = vld [vmem:[%s1905_s23 + $0x60] sm:$0xff] }
  0x5b   : > { %1356 = vmatmul.msk.bf16.gmra.mxu0 %vm347_vm1, %v1596_v28  ;;  %1448 = vmatmul.msk.bf16.vlgmr.msrb.gmra.mxu3 %vm347_vm1, %v1587_v29  ;;  %v1624_v28 = vld [vmem:[%s1905_s23 + $0x88] sm:$0xff] }
  0x5c   : > { %1440 = vmatmul.msk.bf16.gmra.mxu1 %vm347_vm1, %v1579_v30 }
  0x5d   : > { %1558 = vmatmul.msk.bf16.gmra.mxu2 %vm347_vm1, %v1613_v31  ;;  %v1586_v31 = vld [vmem:[%s1905_s23 + $0x58] sm:$0xff] }
  0x6b   : > { %1357 = vmatmul.msk.bf16.gmra.mxu0 %vm347_vm1, %v1597_v32  ;;  %1449 = vmatmul.msk.bf16.gmra.mxu3 %vm347_vm1, %v1588_v33  ;;  %v1620_v32 = vld [vmem:[%s1905_s23 + $0x68] sm:$0xff] }
  0x6c   : > { %1441 = vmatmul.msk.bf16.gmra.mxu1 %vm347_vm1, %v1580_v34 }
  0x6d   : > { %1559 = vmatmul.msk.bf16.gmra.mxu2 %vm347_vm1, %v1614_v35 }
  0x7b   : > { %1358 = vmatmul.msk.bf16.gmra.mxu0 %vm347_vm1, %v1598_v36  ;;  %1450 = vmatmul.msk.bf16.gmra.mxu3 %vm347_vm1, %v1589_v37 }
  0x7c   : > { %1442 = vmatmul.msk.bf16.gmra.mxu1 %vm347_vm1, %v1581_v38 }
  0x7d   : > { %1560 = vmatmul.msk.bf16.gmra.mxu2 %vm347_vm1, %v1615_v39 }
  0x8b   : > { %1359 = vmatmul.msk.bf16.gmra.mxu0 %vm347_vm1, %v1599_v40  ;;  %1451 = vmatmul.msk.bf16.gmra.mxu3 %vm347_vm1, %v1590_v41 }
  0x8c   : > { %1443 = vmatmul.msk.bf16.gmra.mxu1 %vm347_vm1, %v1582_v42 }
  0x8d   : > { %1561 = vmatmul.msk.bf16.gmra.mxu2 %vm347_vm1, %v1616_v43 }
  0x98   : > { %v409_v46 = vpop.f32.mrf.mxu0 }
  0x99   : > { %v634_v49 = vpop.f32.mrf.mxu1 }
  0x9a   : > { %v635_v50 = vadd.f32 %v634_v49, %v409_v46 }
  0x9b   : > { %1360 = vmatmul.msk.bf16.gmra.mxu0 %vm347_vm1, %v1600_v44  ;;  %1566 = vmatmul.msk.bf16.vlgmr.msra.gmra.mxu3 %vm347_vm1, %v1621_v45 }
  0x9c   : > { %1444 = vmatmul.msk.bf16.gmra.mxu1 %vm347_vm1, %v1583_v47 }
  0x9d   : > { %1562 = vmatmul.msk.bf16.gmra.mxu2 %vm347_vm1, %v1617_v48 }
  0x9e   : > { %v1979_v51 = vpop.f32.mrf.mxu3 }
  0xa0   : > { %v898_v52 = vpop.f32.mrf.mxu2  ;;  %v411_v54 = vpop.f32.mrf.mxu0 }
  0xa1   : > { %v1981_v53 = vadd.f32 %v898_v52, %v635_v50  ;;  %v636_v55 = vpop.f32.mrf.mxu1 }
  0xa2   : > { %v637_v56 = vadd.f32 %v636_v55, %v411_v54 }
  0xa6   : > { %v1983_v57 = vpop.f32.mrf.mxu3 }
  0xa8   : > { %v900_v58 = vpop.f32.mrf.mxu2  ;;  %v414_v62 = vpop.f32.mrf.mxu0 }
  0xa9   : > { %v1987_v61 = vadd.f32 %v900_v58, %v637_v56  ;;  %v639_v1 = vpop.f32.mrf.mxu1 }
  0xaa   : > { %v640_v2 = vadd.f32 %v639_v1, %v414_v62 }
  0xab   : > { %1361 = vmatmul.msk.bf16.gmra.mxu0 %vm347_vm1, %v1601_v59  ;;  %1567 = vmatmul.msk.bf16.gmra.mxu3 %vm347_vm1, %v1622_v60 }
  0xac   : > { %1445 = vmatmul.msk.bf16.gmra.mxu1 %vm347_vm1, %v1584_v63 }
  0xad   : > { %1563 = vmatmul.msk.bf16.gmra.mxu2 %vm347_vm1, %v1618_v0 }
  0xae   : > { %v1995_v3 = vpop.f32.mrf.mxu3 }
  0xb0   : > { %v903_v4 = vpop.f32.mrf.mxu2  ;;  %v416_v6 = vpop.f32.mrf.mxu0 }
  0xb1   : > { %v1997_v5 = vadd.f32 %v903_v4, %v640_v2  ;;  %v641_v7 = vpop.f32.mrf.mxu1 }
  0xb2   : > { %v642_v8 = vadd.f32 %v641_v7, %v416_v6 }
  0xb6   : > { %v1999_v9 = vpop.f32.mrf.mxu3 }
  0xb8   : > { %v905_v10 = vpop.f32.mrf.mxu2  ;;  %v419_v14 = vpop.f32.mrf.mxu0 }
  0xb9   : > { %v2003_v13 = vadd.f32 %v905_v10, %v642_v8  ;;  %v644_v17 = vpop.f32.mrf.mxu1 }
  0xba   : > { %v645_v18 = vadd.f32 %v644_v17, %v419_v14 }
  0xbb   : > { %1362 = vmatmul.msk.bf16.gmra.mxu0 %vm347_vm1, %v1602_v11  ;;  %1568 = vmatmul.msk.bf16.gmra.mxu3 %vm347_vm1, %v1623_v12 }
  0xbc   : > { %1446 = vmatmul.msk.bf16.gmra.mxu1 %vm347_vm1, %v1585_v15 }
  0xbd   : > { %1564 = vmatmul.msk.bf16.gmra.mxu2 %vm347_vm1, %v1619_v16 }
  0xbe   : > { %v2011_v19 = vpop.f32.mrf.mxu3 }
  0xc0   : > { %v908_v20 = vpop.f32.mrf.mxu2  ;;  %v421_v22 = vpop.f32.mrf.mxu0 }
  0xc1   : > { %v2013_v21 = vadd.f32 %v908_v20, %v645_v18  ;;  %v646_v23 = vpop.f32.mrf.mxu1 }
  0xc2   : > { %v647_v24 = vadd.f32 %v646_v23, %v421_v22 }
  0xc6   : > { %v2015_v25 = vpop.f32.mrf.mxu3 }
  0xc8   : > { %v910_v26 = vpop.f32.mrf.mxu2  ;;  %v424_v30 = vpop.f32.mrf.mxu0 }
  0xc9   : > { %v2019_v29 = vadd.f32 %v910_v26, %v647_v24  ;;  %v649_v33 = vpop.f32.mrf.mxu1 }
  0xca   : > { %v650_v34 = vadd.f32 %v649_v33, %v424_v30 }
  0xcb   : > { %1363 = vmatmul.msk.bf16.gmra.mxu0 %vm347_vm1, %v1603_v27  ;;  %1569 = vmatmul.msk.bf16.gmra.mxu3 %vm347_vm1, %v1624_v28 }
  0xcc   : > { %1447 = vmatmul.msk.bf16.gmra.mxu1 %vm347_vm1, %v1586_v31 }
  0xcd   : > { %1565 = vmatmul.msk.bf16.gmra.mxu2 %vm347_vm1, %v1620_v32 }
  0xce   : > { %v2027_v35 = vpop.f32.mrf.mxu3 }
  0xd0   : > { %v913_v36 = vpop.f32.mrf.mxu2  ;;  %v426_v38 = vpop.f32.mrf.mxu0 }
  0xd1   : > { %v2029_v37 = vadd.f32 %v913_v36, %v650_v34  ;;  %v651_v39 = vpop.f32.mrf.mxu1 }
  0xd2   : > { %v652_v40 = vadd.f32 %v651_v39, %v426_v38 }
  0xd6   : > { %v2031_v41 = vpop.f32.mrf.mxu3 }
  0xd8   : > { %v915_v42 = vpop.f32.mrf.mxu2  ;;  %v429_v44 = vpop.f32.mrf.mxu0 }
  0xd9   : > { %v2033_v43 = vadd.f32 %v915_v42, %v652_v40  ;;  %v654_v45 = vpop.f32.mrf.mxu1 }
  0xda   : > { %v655_v46 = vadd.f32 %v654_v45, %v429_v44 }
  0xde   : > { %v694_v47 = vpop.f32.mrf.mxu3 }
  0xe0   : > { %v918_v48 = vpop.f32.mrf.mxu2  ;;  %v431_v50 = vpop.f32.mrf.mxu0 }
  0xe1   : > { %v986_v49 = vadd.f32 %v918_v48, %v655_v46  ;;  %v656_v52 = vpop.f32.mrf.mxu1  ;;  %v2062_v46 = vld [vmem:[%s2175_s2] ss:$0 sm:$0xff] }
  0xe2   : > { %v657_v54 = vadd.f32 %v656_v52, %v431_v50  ;;  %v695_v50 = vadd.f32 %v694_v47, %v1979_v51 }
  0xe6   : > { %v696_v55 = vpop.f32.mrf.mxu3 }
  0xe7   : > { %v697_v51 = vadd.f32 %v696_v55, %v1983_v57 }
  0xe8   : > { %v920_v56 = vpop.f32.mrf.mxu2  ;;  %v434_v59 = vpop.f32.mrf.mxu0 }
  0xe9   : > { %v987_v58 = vadd.f32 %v920_v56, %v657_v54  ;;  %v659_v60 = vpop.f32.mrf.mxu1  ;;  %v1022_v54 = vadd.f32 %v2062_v46, %v986_v49 }
  0xea   : > { %v660_v62 = vadd.f32 %v659_v60, %v434_v59 }
  0xee   : > { %v2035_v63 = vpop.f32.mrf.mxu3 }
  0xf0   : > { %v923_v0 = vpop.f32.mrf.mxu2  ;;  %v436_v2 = vpop.f32.mrf.mxu0 }
  0xf1   : > { %v2037_v1 = vadd.f32 %v923_v0, %v660_v62  ;;  %v661_v4 = vpop.f32.mrf.mxu1  ;;  %v1014_v0 = vadd.f32 %v2062_v46, %v1981_v53 }
  0xf2   : > { %v662_v6 = vadd.f32 %v661_v4, %v436_v2 }
  0xf6   : > { %v2039_v7 = vpop.f32.mrf.mxu3 }
  0xf8   : > { %v925_v8 = vpop.f32.mrf.mxu2  ;;  %v439_v11 = vpop.f32.mrf.mxu0 }
  0xf9   : > { %v2041_v10 = vadd.f32 %v925_v8, %v662_v6  ;;  %v664_v12 = vpop.f32.mrf.mxu1  ;;  %v1054_v8 = vmax.f32 %v1022_v54, 0.0  ;;  %v1016_v54 = vadd.f32 %v2062_v46, %v1997_v5 }
  0xfa   : > { %v665_v14 = vadd.f32 %v664_v12, %v439_v11  ;;  %v1046_v12 = vmax.f32 %v1014_v0, 0.0 }
  0xfe   : > { %v2043_v15 = vpop.f32.mrf.mxu3 }
 0x100   : > { %v928_v16 = vpop.f32.mrf.mxu2  ;;  %v441_v18 = vpop.f32.mrf.mxu0 }
 0x101   : > { %v2045_v17 = vadd.f32 %v928_v16, %v665_v14  ;;  %v666_v20 = vpop.f32.mrf.mxu1 }
 0x102   : > { %v667_v22 = vadd.f32 %v666_v20, %v441_v18  ;;  %v1023_v20 = vadd.f32 %v2062_v46, %v987_v58  ;;  %v700_v58 = vadd.f32 %v2035_v63, %v1995_v3 }
 0x104   : > { %v1055_v55 = vmax.f32 %v1023_v20, 0.0 }
 0x106   : > { %v2047_v23 = vpop.f32.mrf.mxu3 }
 0x108   : > { %v930_v24 = vpop.f32.mrf.mxu2  ;;  %v444_v27 = vpop.f32.mrf.mxu0 }
 0x109   : > { %v2049_v26 = vadd.f32 %v930_v24, %v667_v22  ;;  %v669_v28 = vpop.f32.mrf.mxu1  ;;  %v1015_v24 = vadd.f32 %v2062_v46, %v1987_v61 }
 0x10a   : > { %v670_v30 = vadd.f32 %v669_v28, %v444_v27 }
 0x10e   : > { %v2051_v31 = vpop.f32.mrf.mxu3 }
 0x110   : > { %v933_v32 = vpop.f32.mrf.mxu2  ;;  %v446_v34 = vpop.f32.mrf.mxu0 }
 0x111   : > { %v2053_v33 = vadd.f32 %v933_v32, %v670_v30  ;;  %v671_v36 = vpop.f32.mrf.mxu1 }
 0x112   : > { %v672_v38 = vadd.f32 %v671_v36, %v446_v34  ;;  %v1047_v36 = vmax.f32 %v1015_v24, 0.0 }
 0x116   : > { %v2055_v39 = vpop.f32.mrf.mxu3 }
 0x118   : > { %v935_v40 = vpop.f32.mrf.mxu2  ;;  %v449_v44 = vpop.f32.mrf.mxu0 }
 0x119   : > { %v2057_v42 = vadd.f32 %v935_v40, %v672_v38  ;;  %v674_v45 = vpop.f32.mrf.mxu1 }
 0x11a   : > { %v675_v48 = vadd.f32 %v674_v45, %v449_v44 }
 0x11e   : > { %v958_v52 = vpop.f32.mrf.mxu3 }
 0x11f   : > { %v1002_v59 = vadd.f32 %v958_v52, %v695_v50 }
 0x120   : > { %v938_v56 = vpop.f32.mrf.mxu2  ;;  %v451_v62 = vpop.f32.mrf.mxu0 }
 0x121   : > { %v994_v60 = vadd.f32 %v938_v56, %v675_v48  ;;  %v1038_v2 = vadd.f32 %v2062_v46, %v1002_v59  ;;  %v676_v4 = vpop.f32.mrf.mxu1  ;;  %v1024_v48 = vadd.f32 %v2062_v46, %v2037_v1  ;;  %v702_v1 = vadd.f32 %v2039_v7, %v1999_v9 }
 0x122   : > { %v677_v49 = vadd.f32 %v676_v4, %v451_v62 }
 0x123   : > { %v1030_v6 = vadd.f32 %v2062_v46, %v994_v60  ;;  %v1070_v11 = vmax.f32 %v1038_v2, 0.0  ;;  %v1056_v63 = vmax.f32 %v1024_v48, 0.0  ;;  %v1048_v2 = vmax.f32 %v1016_v54, 0.0 }
 0x125   : > { %v1062_v14 = vmax.f32 %v1030_v6, 0.0  ;;  %v2071_v47 = vpack.i.bf16 %v1070_v11, %v1054_v8 }
 0x126   : > { %v960_v16 = vpop.f32.mrf.mxu3 }
 0x127   : > { %v1686_v18 = vpack.i.bf16 %v1062_v14, %v1046_v12  ;;  %v1003_v53 = vadd.f32 %v960_v16, %v697_v51  ;;  %v1025_v12 = vadd.f32 %v2062_v46, %v2041_v10  ;;  %v705_v10 = vadd.f32 %v2043_v15, %v2011_v19 }
 0x128   : > { %v940_v22 = vpop.f32.mrf.mxu2  ;;  %v454_v28 = vpop.f32.mrf.mxu0 }
 0x129   : > { %v995_v27 = vadd.f32 %v940_v22, %v677_v49  ;;  %1687 = vxpose.xlu0.b32.start [1/16] (narrow) %v1686_v18, 8  ;;  %v1039_v30 = vadd.f32 %v2062_v46, %v1003_v53  ;;  %v679_v32 = vpop.f32.mrf.mxu1  ;;  %v1017_v49 = vadd.f32 %v2062_v46, %v2003_v13  ;;  %v1057_v7 = vmax.f32 %v1025_v12, 0.0 }
 0x12a   : > { %v680_v40 = vadd.f32 %v679_v32, %v454_v28 }
 0x12b   : > { %v1031_v57 = vadd.f32 %v2062_v46, %v995_v27  ;;  %v1071_v34 = vmax.f32 %v1039_v30, 0.0  ;;  %v1049_v24 = vmax.f32 %v1017_v49, 0.0 }
 0x12d   : > { %v1063_v38 = vmax.f32 %v1031_v57, 0.0  ;;  %v2080_v44 = vpack.i.bf16 %v1071_v34, %v1055_v55  ;;  %v1026_v57 = vadd.f32 %v2062_v46, %v2045_v17  ;;  %v707_v17 = vadd.f32 %v2047_v23, %v2015_v25 }
 0x12e   : > { %v963_v45 = vpop.f32.mrf.mxu3 }
 0x12f   : > { %v1688_v61 = vpack.i.bf16 %v1063_v38, %v1047_v36  ;;  %v1004_v52 = vadd.f32 %v963_v45, %v700_v58  ;;  %v1018_v36 = vadd.f32 %v2062_v46, %v2013_v21  ;;  %v1058_v15 = vmax.f32 %v1026_v57, 0.0 }
 0x130   : > { %v943_v50 = vpop.f32.mrf.mxu2  ;;  %v456_v59 = vpop.f32.mrf.mxu0  ;;  %v1027_v21 = vadd.f32 %v2062_v46, %v2049_v26  ;;  %v710_v26 = vadd.f32 %v2051_v31, %v2027_v35 }
 0x131   : > { %v996_v56 = vadd.f32 %v943_v50, %v680_v40  ;;  %1689 = vxpose.xlu0.b32.cont [2/16] (narrow) %v1688_v61, 8  ;;  %v1040_v60 = vadd.f32 %v2062_v46, %v1004_v52  ;;  %v681_v62 = vpop.f32.mrf.mxu1  ;;  %v1050_v48 = vmax.f32 %v1018_v36, 0.0 }
 0x132   : > { %v682_v8 = vadd.f32 %v681_v62, %v456_v59  ;;  %v1059_v23 = vmax.f32 %v1027_v21, 0.0 }
 0x133   : > { %v1032_v3 = vadd.f32 %v2062_v46, %v996_v56  ;;  %v1072_v0 = vmax.f32 %v1040_v60, 0.0 }
 0x135   : > { %v1064_v4 = vmax.f32 %v1032_v3, 0.0  ;;  %v2090_v6 = vpack.i.bf16 %v1072_v0, %v1056_v63  ;;  %v1019_v3 = vadd.f32 %v2062_v46, %v2019_v29  ;;  %v1028_v29 = vadd.f32 %v2062_v46, %v2053_v33 }
 0x136   : > { %v965_v11 = vpop.f32.mrf.mxu3  ;;  %v712_v33 = vadd.f32 %v2055_v39, %v2031_v41 }
 0x137   : > { %v1690_v5 = vpack.i.bf16 %v1064_v4, %v1048_v2  ;;  %v1005_v51 = vadd.f32 %v965_v11, %v702_v1 }
 0x138   : > { %v945_v14 = vpop.f32.mrf.mxu2  ;;  %v459_v18 = vpop.f32.mrf.mxu0 }
 0x139   : > { %v997_v16 = vadd.f32 %v945_v14, %v682_v8  ;;  %1691 = vxpose.xlu0.b32.cont [3/16] (narrow) %v1690_v5, 8  ;;  %v1041_v20 = vadd.f32 %v2062_v46, %v1005_v51  ;;  %v684_v22 = vpop.f32.mrf.mxu1  ;;  %v1051_v8 = vmax.f32 %v1019_v3, 0.0 }
 0x13a   : > { %v685_v28 = vadd.f32 %v684_v22, %v459_v18  ;;  %v1020_v18 = vadd.f32 %v2062_v46, %v2029_v37  ;;  %v1029_v37 = vadd.f32 %v2062_v46, %v2057_v42 }
 0x13b   : > { %v1033_v9 = vadd.f32 %v2062_v46, %v997_v16  ;;  %v1073_v53 = vmax.f32 %v1041_v20, 0.0 }
 0x13c   : > { %v1061_v41 = vmax.f32 %v1029_v37, 0.0 }
 0x13d   : > { %v1065_v27 = vmax.f32 %v1033_v9, 0.0  ;;  %v2100_v30 = vpack.i.bf16 %v1073_v53, %v1057_v7  ;;  %v1060_v7 = vmax.f32 %v1028_v29, 0.0 }
 0x13e   : > { %v968_v32 = vpop.f32.mrf.mxu3 }
 0x13f   : > { %v1692_v13 = vpack.i.bf16 %v1065_v27, %v1049_v24  ;;  %v1006_v34 = vadd.f32 %v968_v32, %v705_v10  ;;  %v1052_v24 = vmax.f32 %v1020_v18, 0.0 }
 0x140   : > { %v948_v55 = vpop.f32.mrf.mxu2  ;;  %v461_v40 = vpop.f32.mrf.mxu0 }
 0x141   : > { %v998_v38 = vadd.f32 %v948_v55, %v685_v28  ;;  %1693 = vxpose.xlu0.b32.cont [4/16] (narrow) %v1692_v13, 8  ;;  %v1042_v58 = vadd.f32 %v2062_v46, %v1006_v34  ;;  %v686_v45 = vpop.f32.mrf.mxu1  ;;  %v1021_v34 = vadd.f32 %v2062_v46, %v2033_v43 }
 0x142   : > { %v687_v54 = vadd.f32 %v686_v45, %v461_v40 }
 0x143   : > { %v1034_v19 = vadd.f32 %v2062_v46, %v998_v38  ;;  %v1074_v61 = vmax.f32 %v1042_v58, 0.0  ;;  %v1053_v58 = vmax.f32 %v1021_v34, 0.0 }
 0x145   : > { %v1066_v50 = vmax.f32 %v1034_v19, 0.0  ;;  %v1710_v52 = vpack.i.bf16 %v1074_v61, %v1058_v15 }
 0x146   : > { %v970_v56 = vpop.f32.mrf.mxu3 }
 0x147   : > { %v1694_v59 = vpack.i.bf16 %v1066_v50, %v1050_v48  ;;  %v1007_v62 = vadd.f32 %v970_v56, %v707_v17 }
 0x148   : > { %v950_v60 = vpop.f32.mrf.mxu2  ;;  %v464_v2 = vpop.f32.mrf.mxu0 }
 0x149   : > { %v999_v63 = vadd.f32 %v950_v60, %v687_v54  ;;  %1695 = vxpose.xlu0.b32.cont [5/16] (narrow) %v1694_v59, 8  ;;  %v1043_v0 = vadd.f32 %v2062_v46, %v1007_v62  ;;  %v689_v4 = vpop.f32.mrf.mxu1 }
 0x14a   : > { %v690_v5 = vadd.f32 %v689_v4, %v464_v2 }
 0x14b   : > { %v1035_v25 = vadd.f32 %v2062_v46, %v999_v63  ;;  %v1075_v1 = vmax.f32 %v1043_v0, 0.0 }
 0x14d   : > { %v1067_v11 = vmax.f32 %v1035_v25, 0.0  ;;  %v1712_v12 = vpack.i.bf16 %v1075_v1, %v1059_v23 }
 0x14e   : > { %v973_v14 = vpop.f32.mrf.mxu3 }
 0x14f   : > { %v1696_v51 = vpack.i.bf16 %v1067_v11, %v1051_v8  ;;  %v1008_v16 = vadd.f32 %v973_v14, %v710_v26 }
 0x150   : > { %v953_v49 = vpop.f32.mrf.mxu2  ;;  %v466_v35 = vpop.f32.mrf.mxu0 }
 0x151   : > { %v1000_v20 = vadd.f32 %v953_v49, %v690_v5  ;;  %1697 = vxpose.xlu0.b32.cont [6/16] (narrow) %v1696_v51, 8  ;;  %v1044_v22 = vadd.f32 %v2062_v46, %v1008_v16  ;;  %v691_v31 = vpop.f32.mrf.mxu1 }
 0x152   : > { %v692_v10 = vadd.f32 %v691_v31, %v466_v35 }
 0x153   : > { %v1036_v9 = vadd.f32 %v2062_v46, %v1000_v20  ;;  %v1076_v53 = vmax.f32 %v1044_v22, 0.0 }
 0x155   : > { %v1068_v27 = vmax.f32 %v1036_v9, 0.0  ;;  %v1714_v28 = vpack.i.bf16 %v1076_v53, %v1060_v7 }
 0x156   : > { %v975_v32 = vpop.f32.mrf.mxu3 }
 0x157   : > { %v1698_v13 = vpack.i.bf16 %v1068_v27, %v1052_v24  ;;  %v1009_v55 = vadd.f32 %v975_v32, %v712_v33 }
 0x158   : > { %v955_v57 = vpop.f32.mrf.mxu2 }
 0x159   : > { %v1001_v36 = vadd.f32 %v955_v57, %v692_v10  ;;  %1699 = vxpose.xlu0.b32.cont [7/16] (narrow) %v1698_v13, 8  ;;  %v1045_v38 = vadd.f32 %v2062_v46, %v1009_v55 }
 0x15b   : > { %v1037_v40 = vadd.f32 %v2062_v46, %v1001_v36  ;;  %v1077_v39 = vmax.f32 %v1045_v38, 0.0 }
 0x15d   : > { %v1069_v45 = vmax.f32 %v1037_v40, 0.0  ;;  %v1716_v19 = vpack.i.bf16 %v1077_v39, %v1061_v41 }
 0x15f   : > { %v1700_v15 = vpack.i.bf16 %v1069_v45, %v1053_v58 }
 0x161   : > { %1701 = vxpose.xlu0.b32.cont [8/16] (narrow) %v1700_v15, 8 }
 0x169   : > { %1703 = vxpose.xlu0.b32.cont [9/16] (narrow) %v2071_v47, 8 }
 0x171   : > { %1705 = vxpose.xlu0.b32.cont [10/16] (narrow) %v2080_v44, 8 }
 0x179   : > { %1707 = vxpose.xlu0.b32.cont [11/16] (narrow) %v2090_v6, 8 }
 0x181   : > { %1709 = vxpose.xlu0.b32.cont [12/16] (narrow) %v2100_v30, 8 }
 0x189   : > { %1711 = vxpose.xlu0.b32.cont [13/16] (narrow) %v1710_v52, 8 }
 0x191   : > { %1713 = vxpose.xlu0.b32.cont [14/16] (narrow) %v1712_v12, 8 }
 0x199   : > { %1715 = vxpose.xlu0.b32.cont [15/16] (narrow) %v1714_v28, 8 }
 0x1a1   : > { %1717 = vxpose.xlu0.b32.end [16/16] (narrow) %v1716_v19, 8 }
 0x1cd   : > { %v1718_v43 = vpop.trf.xlu0 }
 0x1ce   : > { %v1722_v42 = vunpack.i.h.bf16 %v1718_v43  ;;  %v1719_v46 = vunpack.i.l.bf16 %v1718_v43 }
 0x1d0   : > { %v1142_v47 = vpack.c.bf16 %v1722_v42, %v1719_v46 }
 0x1d2   : > { %1143 = vst [vmem:[%s177_s7] sm:$0xff] %v1142_v47 }
 0x1d3   : > { %1751 = shalt.err (!%p1748_p5)
}
 0x1d4   : > { %1631 = dma.vmem_to_hbm [thread:$0]  (%p1864_p4), %s1161_s8, 128, %s1163_s9, %s1145_s10  }
 0x1d5 PF: > { %p1637_p6 = scmp.ge.s32.totalorder %s1802_s17, 2  ;;  %s1174_s27 = sand.u32 1, %s1782_s12  }
 0x1d6   : > { %s1175_s28 = scalar_lea.sflag [#allocation3], %s1174_s27 }
 0x1d7   : > { %p1634_p7 = pnand %p1637_p6, %p1871_p8 }
 0x1d9   : > { %p1635_p9 = pneg %p1634_p7 }
 0x1db   : > { %1777 = dma.done.wait (%p1635_p9), %s1175_s28, 128  }
 0x1dc   : > { %1779 = vsyncadd (%p1635_p9), %s1175_s28, 4294967168  ;;  %s16_s17 = sadd.s32 1, %s1802_s17   ;;  %s2179_s12 = smov %s1786_s13 }
 0x1dd   : > { %p13_p10 = scmp.ge.s32.totalorder %s16_s17, 4   ;;  %s2180_s13 = smov %s1790_s14 }
 0x1de   : > { %s2181_s14 = smov %s1877_s25  ;;  %s2182_s15 = smov %s1798_s16 }
 0x1df   : > { %s2183_s16 = smov %s2185_s20  ;;  %15 = sbr.rel (!%p13_p10) target bundleno = 4 (0x4), region = 72 }
 0x1e4   :  { %1181 = vsyncpa [#allocation3], 1 }
 0x1e5   :  { %1183 = vsyncpa [#allocation3 + $0x1], 1 }

// kernel: tpu_custom_call.1
= control target key start
LH: loop header
LB: loop body
LE: loop exit
PB: predicated region body
PF: predicated region fallthrough
CT: control target
= control target key end

     0   :  { %s1699_s12 = smov 0   ;;  %s1701_s13 = smov 0   ;;  %s2006_s0 = inlined_call_operand.vmem [shape: bf16[2,18,16,12], index: 0, kind: input, shape index: {}]   ;;  %s2007_s1 = inlined_call_operand.vmem [shape: bf16[3,12,128], index: 1, kind: input, shape index: {}]   ;;  %s2008_s2 = inlined_call_operand.vmem [shape: f32[1,128], index: 2, kind: input, shape index: {}]   ;;  %s2009_s3 = inlined_call_operand.vmem [shape: bf16[2,256,8], index: 3, kind: output, shape index: {}]  }
   0x1   :  { %s1703_s14 = smov 0  }
   0x2 LB: > { %s25_s15 = sadd.s32 1, %s1673_s13  ;;  %p1248_p0 = scmp.ge.s32.totalorder %s1677_s14, 1  ;;  %s1677_s14 = sphi %s1703_s14, %s13_s14   ;;  %s1673_s13 = sphi %s1701_s13, %s2011_s13   ;;  %s1669_s12 = sphi %s1699_s12, %s2010_s12  }
   0x3   : > { %p27_p1 = scmp.ge.s32.totalorder %s25_s15, 2  ;;  %p151_p2 = scmp.lt.s32.totalorder %s1677_s14, 3 }
   0x5   : > { %s2013_s15 = smov (%p27_p1, %s25_s15), 0  ;;  %p152_p3 = pnand %p1248_p0, %p151_p2 }
   0x6   : > { %p179_p4 = scmp.lt.s32.totalorder (!%p152_p3), %s1669_s12, 1 }
   0x7   : > { %155 = sbr.rel (%p152_p3) target bundleno = 346 (0x15a), region = 32 }
   0xc   : > { %v1352_v0 = vld [vmem:[%s2007_s1 + $0x8] sm:$0xf]  ;;  %v1608_v1 = vld [vmem:[%s2007_s1 + $0x8] sm:$0x30]  ;;  %vm406_vm0 = vcmask 1045504   ;;  %s2015_s12 = smov (!%p179_p4, %s1669_s12), 1 }
   0xd   : > { %v1353_v2 = vor.u32 %v1608_v1, %v1352_v0  ;;  %v1436_v3 = vld [vmem:[%s2007_s1] sm:$0xf]  ;;  %v1591_v4 = vld [vmem:[%s2007_s1] sm:$0x30]  ;;  %v1554_v5 = vld [vmem:[%s2007_s1 + $0x10] sm:$0xf] }
   0xe   : > { %v1437_v6 = vor.u32 %v1591_v4, %v1436_v3  ;;  %v1625_v7 = vld [vmem:[%s2007_s1 + $0x10] sm:$0x30]  ;;  %s1629_s28 = smul.u32 144, %s2015_s12  ;;  %vm357_vm1 = vcmask 97280   ;;  %v1823_v52 = vld [vmem:[%s2008_s2] ss:$0 sm:$0xff] }
   0xf   : > { %v408_v8 = vsel %vm406_vm0, %v1353_v2, 0  ;;  %v1555_v9 = vor.u32 %v1625_v7, %v1554_v5  ;;  %s1574_s7 = sshll.u32 %s2015_s12, 7  ;;  %vm1120_vm2 = vcmask 60416  }
  0x10   : > { %417 = vmatpush.bf16.msra.mxu0 %v408_v8  ;;  %1626 = vmatpush.bf16.msra.mxu3 %v408_v8  ;;  %v633_v10 = vsel %vm406_vm0, %v1437_v6, 0  ;;  %s1744_s4 = scalar_lea.vmem %s2006_s0, %s1629_s28  ;;  %s1830_s10 = scalar_lea.vmem %s2009_s3, %s1574_s7 }
  0x11   : > { %642 = vmatpush.bf16.msra.mxu1 %v633_v10  ;;  %v897_v11 = vsel %vm406_vm0, %v1555_v9, 0  ;;  %v1592_v12 = vld [vmem:[%s1744_s4 + $0x8] sm:$0xff]  ;;  %v1575_v14 = vld [vmem:[%s1744_s4] sm:$0xff]  ;;  %v1609_v15 = vld [vmem:[%s1744_s4 + $0x10] sm:$0xff] }
  0x12   : > { %906 = vmatpush.bf16.msra.mxu2 %v897_v11  ;;  %v1604_v13 = vld [vmem:[%s1744_s4 + $0x68] sm:$0xff]  ;;  %v1593_v16 = vld [vmem:[%s1744_s4 + $0x10] sm:$0xff]  ;;  %v1610_v19 = vld [vmem:[%s1744_s4 + $0x18] sm:$0xff] }
  0x13   : > { %1354 = vmatmul.msk.bf16.vlgmr.msra.gmra.mxu0 %vm357_vm1, %v1592_v12  ;;  %1366 = vmatmul.msk.bf16.vlgmr.msra.gmra.mxu3 %vm357_vm1, %v1604_v13  ;;  %v1605_v17 = vld [vmem:[%s1744_s4 + $0x70] sm:$0xff]  ;;  %v1576_v18 = vld [vmem:[%s1744_s4 + $0x8] sm:$0xff]  ;;  %v1594_v20 = vld [vmem:[%s1744_s4 + $0x18] sm:$0xff] }
  0x14   : > { %1627 = vmatpush.bf16.msrb.mxu3 %v633_v10  ;;  %1438 = vmatmul.msk.bf16.vlgmr.msra.gmra.mxu1 %vm357_vm1, %v1575_v14  ;;  %v1606_v21 = vld [vmem:[%s1744_s4 + $0x78] sm:$0xff]  ;;  %v1577_v22 = vld [vmem:[%s1744_s4 + $0x10] sm:$0xff]  ;;  %v1611_v23 = vld [vmem:[%s1744_s4 + $0x20] sm:$0xff] }
  0x15   : > { %1556 = vmatmul.msk.bf16.vlgmr.msra.gmra.mxu2 %vm357_vm1, %v1609_v15  ;;  %v1595_v24 = vld [vmem:[%s1744_s4 + $0x20] sm:$0xff]  ;;  %v1578_v26 = vld [vmem:[%s1744_s4 + $0x18] sm:$0xff]  ;;  %v1612_v27 = vld [vmem:[%s1744_s4 + $0x28] sm:$0xff] }
  0x16   : > { %v1607_v25 = vld [vmem:[%s1744_s4 + $0x80] sm:$0xff]  ;;  %v1596_v28 = vld [vmem:[%s1744_s4 + $0x28] sm:$0xff]  ;;  %v1613_v31 = vld [vmem:[%s1744_s4 + $0x30] sm:$0xff] }
  0x17   : > { %v1587_v29 = vld [vmem:[%s1744_s4 + $0x60] sm:$0xff]  ;;  %v1597_v32 = vld [vmem:[%s1744_s4 + $0x30] sm:$0xff]  ;;  %v1588_v33 = vld [vmem:[%s1744_s4 + $0x68] sm:$0xff] }
  0x18   : > { %1628 = vmatpush.bf16.msra.mxu3 %v897_v11  ;;  %v1579_v30 = vld [vmem:[%s1744_s4 + $0x20] sm:$0xff]  ;;  %v1580_v34 = vld [vmem:[%s1744_s4 + $0x28] sm:$0xff]  ;;  %v1614_v35 = vld [vmem:[%s1744_s4 + $0x38] sm:$0xff] }
  0x19   : > { %v1598_v36 = vld [vmem:[%s1744_s4 + $0x38] sm:$0xff]  ;;  %v1589_v37 = vld [vmem:[%s1744_s4 + $0x70] sm:$0xff]  ;;  %v1615_v39 = vld [vmem:[%s1744_s4 + $0x40] sm:$0xff] }
  0x1a   : > { %v1581_v38 = vld [vmem:[%s1744_s4 + $0x30] sm:$0xff]  ;;  %v1599_v40 = vld [vmem:[%s1744_s4 + $0x40] sm:$0xff]  ;;  %v1590_v41 = vld [vmem:[%s1744_s4 + $0x78] sm:$0xff] }
  0x1b   : > { %v1582_v42 = vld [vmem:[%s1744_s4 + $0x38] sm:$0xff]  ;;  %v1616_v43 = vld [vmem:[%s1744_s4 + $0x48] sm:$0xff]  ;;  %v1621_v45 = vld [vmem:[%s1744_s4 + $0x70] sm:$0xff] }
  0x1c   : > { %v1600_v44 = vld [vmem:[%s1744_s4 + $0x48] sm:$0xff]  ;;  %v1583_v47 = vld [vmem:[%s1744_s4 + $0x40] sm:$0xff]  ;;  %v1617_v48 = vld [vmem:[%s1744_s4 + $0x50] sm:$0xff] }
  0x1d   : > { %v1601_v63 = vld [vmem:[%s1744_s4 + $0x50] sm:$0xff]  ;;  %v1622_v0 = vld [vmem:[%s1744_s4 + $0x78] sm:$0xff]  ;;  %v1584_v3 = vld [vmem:[%s1744_s4 + $0x48] sm:$0xff] }
  0x1e   : > { %v1618_v4 = vld [vmem:[%s1744_s4 + $0x58] sm:$0xff] }
  0x23   : > { %1355 = vmatmul.msk.bf16.gmra.mxu0 %vm357_vm1, %v1593_v16  ;;  %1367 = vmatmul.msk.bf16.gmra.mxu3 %vm357_vm1, %v1605_v17 }
  0x24   : > { %1439 = vmatmul.msk.bf16.gmra.mxu1 %vm357_vm1, %v1576_v18 }
  0x25   : > { %1557 = vmatmul.msk.bf16.gmra.mxu2 %vm357_vm1, %v1610_v19 }
  0x33   : > { %1356 = vmatmul.msk.bf16.gmra.mxu0 %vm357_vm1, %v1594_v20  ;;  %1368 = vmatmul.msk.bf16.gmra.mxu3 %vm357_vm1, %v1606_v21  ;;  %v1602_v21 = vld [vmem:[%s1744_s4 + $0x58] sm:$0xff] }
  0x34   : > { %1440 = vmatmul.msk.bf16.gmra.mxu1 %vm357_vm1, %v1577_v22  ;;  %v1623_v22 = vld [vmem:[%s1744_s4 + $0x80] sm:$0xff] }
  0x35   : > { %1558 = vmatmul.msk.bf16.gmra.mxu2 %vm357_vm1, %v1611_v23 }
  0x43   : > { %1357 = vmatmul.msk.bf16.gmra.mxu0 %vm357_vm1, %v1595_v24  ;;  %1369 = vmatmul.msk.bf16.gmra.mxu3 %vm357_vm1, %v1607_v25  ;;  %v1585_v25 = vld [vmem:[%s1744_s4 + $0x50] sm:$0xff] }
  0x44   : > { %1441 = vmatmul.msk.bf16.gmra.mxu1 %vm357_vm1, %v1578_v26  ;;  %v1619_v26 = vld [vmem:[%s1744_s4 + $0x60] sm:$0xff] }
  0x45   : > { %1559 = vmatmul.msk.bf16.gmra.mxu2 %vm357_vm1, %v1612_v27 }
  0x53   : > { %1358 = vmatmul.msk.bf16.gmra.mxu0 %vm357_vm1, %v1596_v28  ;;  %1450 = vmatmul.msk.bf16.vlgmr.msrb.gmra.mxu3 %vm357_vm1, %v1587_v29 }
  0x54   : > { %1442 = vmatmul.msk.bf16.gmra.mxu1 %vm357_vm1, %v1579_v30 }
  0x55   : > { %1560 = vmatmul.msk.bf16.gmra.mxu2 %vm357_vm1, %v1613_v31 }
  0x63   : > { %1359 = vmatmul.msk.bf16.gmra.mxu0 %vm357_vm1, %v1597_v32  ;;  %1451 = vmatmul.msk.bf16.gmra.mxu3 %vm357_vm1, %v1588_v33 }
  0x64   : > { %1443 = vmatmul.msk.bf16.gmra.mxu1 %vm357_vm1, %v1580_v34 }
  0x65   : > { %1561 = vmatmul.msk.bf16.gmra.mxu2 %vm357_vm1, %v1614_v35 }
  0x73   : > { %1360 = vmatmul.msk.bf16.gmra.mxu0 %vm357_vm1, %v1598_v36  ;;  %1452 = vmatmul.msk.bf16.gmra.mxu3 %vm357_vm1, %v1589_v37 }
  0x74   : > { %1444 = vmatmul.msk.bf16.gmra.mxu1 %vm357_vm1, %v1581_v38 }
  0x75   : > { %1562 = vmatmul.msk.bf16.gmra.mxu2 %vm357_vm1, %v1615_v39 }
  0x83   : > { %1361 = vmatmul.msk.bf16.gmra.mxu0 %vm357_vm1, %v1599_v40  ;;  %1453 = vmatmul.msk.bf16.gmra.mxu3 %vm357_vm1, %v1590_v41 }
  0x84   : > { %1445 = vmatmul.msk.bf16.gmra.mxu1 %vm357_vm1, %v1582_v42 }
  0x85   : > { %1563 = vmatmul.msk.bf16.gmra.mxu2 %vm357_vm1, %v1616_v43  ;;  %v1603_v43 = vld [vmem:[%s1744_s4 + $0x60] sm:$0xff] }
  0x90   : > { %v419_v46 = vpop.f32.mrf.mxu0 }
  0x91   : > { %v644_v49 = vpop.f32.mrf.mxu1 }
  0x92   : > { %v645_v50 = vadd.f32 %v644_v49, %v419_v46 }
  0x93   : > { %1362 = vmatmul.msk.bf16.gmra.mxu0 %vm357_vm1, %v1600_v44  ;;  %1568 = vmatmul.msk.bf16.vlgmr.msra.gmra.mxu3 %vm357_vm1, %v1621_v45  ;;  %v1624_v44 = vld [vmem:[%s1744_s4 + $0x88] sm:$0xff] }
  0x94   : > { %1446 = vmatmul.msk.bf16.gmra.mxu1 %vm357_vm1, %v1583_v47  ;;  %v1586_v47 = vld [vmem:[%s1744_s4 + $0x58] sm:$0xff] }
  0x95   : > { %1564 = vmatmul.msk.bf16.gmra.mxu2 %vm357_vm1, %v1617_v48  ;;  %v1620_v48 = vld [vmem:[%s1744_s4 + $0x68] sm:$0xff] }
  0x96   : > { %v1818_v51 = vpop.f32.mrf.mxu3 }
  0x98   : > { %v908_v53 = vpop.f32.mrf.mxu2  ;;  %v421_v55 = vpop.f32.mrf.mxu0 }
  0x99   : > { %v988_v54 = vadd.f32 %v908_v53, %v645_v50  ;;  %v646_v56 = vpop.f32.mrf.mxu1 }
  0x9a   : > { %v647_v60 = vadd.f32 %v646_v56, %v421_v55 }
  0x9b   : > { %v1024_v57 = vadd.f32 %v1823_v52, %v988_v54 }
  0x9d   : > { %v1056_v58 = vmax.f32 %v1024_v57, 0.0 }
  0x9e   : > { %v1832_v61 = vpop.f32.mrf.mxu3 }
  0x9f   : > { %v1088_v59 = vpack.c.bf16 %v1056_v58, %v1056_v58 }
  0xa0   : > { %v910_v62 = vpop.f32.mrf.mxu2  ;;  %v424_v2 = vpop.f32.mrf.mxu0 }
  0xa1   : > { %1121 = vst.msk [vmem:[%s1830_s10] sm:$0xf] %vm1120_vm2, %v1088_v59  ;;  %v989_v1 = vadd.f32 %v910_v62, %v647_v60  ;;  %v649_v5 = vpop.f32.mrf.mxu1 }
  0xa2   : > { %v650_v8 = vadd.f32 %v649_v5, %v424_v2 }
  0xa3   : > { %v1025_v6 = vadd.f32 %v1823_v52, %v989_v1  ;;  %1363 = vmatmul.msk.bf16.gmra.mxu0 %vm357_vm1, %v1601_v63  ;;  %1569 = vmatmul.msk.bf16.gmra.mxu3 %vm357_vm1, %v1622_v0 }
  0xa4   : > { %1447 = vmatmul.msk.bf16.gmra.mxu1 %vm357_vm1, %v1584_v3 }
  0xa5   : > { %v1057_v7 = vmax.f32 %v1025_v6, 0.0  ;;  %1565 = vmatmul.msk.bf16.gmra.mxu2 %vm357_vm1, %v1618_v4 }
  0xa6   : > { %v1845_v10 = vpop.f32.mrf.mxu3 }
  0xa7   : > { %v1089_v9 = vpack.c.bf16 %v1057_v7, %v1057_v7 }
  0xa8   : > { %v913_v11 = vpop.f32.mrf.mxu2  ;;  %v426_v13 = vpop.f32.mrf.mxu0 }
  0xa9   : > { %1122 = vst.msk [vmem:[%s1830_s10 + $0x4] sm:$0xf] %vm1120_vm2, %v1089_v9  ;;  %v990_v12 = vadd.f32 %v913_v11, %v650_v8  ;;  %v651_v14 = vpop.f32.mrf.mxu1 }
  0xaa   : > { %v652_v18 = vadd.f32 %v651_v14, %v426_v13 }
  0xab   : > { %v1026_v15 = vadd.f32 %v1823_v52, %v990_v12 }
  0xad   : > { %v1058_v16 = vmax.f32 %v1026_v15, 0.0 }
  0xae   : > { %v1850_v19 = vpop.f32.mrf.mxu3 }
  0xaf   : > { %v1090_v17 = vpack.c.bf16 %v1058_v16, %v1058_v16 }
  0xb0   : > { %v915_v20 = vpop.f32.mrf.mxu2  ;;  %v429_v24 = vpop.f32.mrf.mxu0 }
  0xb1   : > { %1123 = vst.msk [vmem:[%s1830_s10 + $0x8] sm:$0xf] %vm1120_vm2, %v1090_v17  ;;  %v991_v23 = vadd.f32 %v915_v20, %v652_v18  ;;  %v654_v27 = vpop.f32.mrf.mxu1 }
  0xb2   : > { %v655_v30 = vadd.f32 %v654_v27, %v429_v24 }
  0xb3   : > { %v1027_v28 = vadd.f32 %v1823_v52, %v991_v23  ;;  %1364 = vmatmul.msk.bf16.gmra.mxu0 %vm357_vm1, %v1602_v21  ;;  %1570 = vmatmul.msk.bf16.gmra.mxu3 %vm357_vm1, %v1623_v22 }
  0xb4   : > { %1448 = vmatmul.msk.bf16.gmra.mxu1 %vm357_vm1, %v1585_v25 }
  0xb5   : > { %v1059_v29 = vmax.f32 %v1027_v28, 0.0  ;;  %1566 = vmatmul.msk.bf16.gmra.mxu2 %vm357_vm1, %v1619_v26 }
  0xb6   : > { %v1863_v32 = vpop.f32.mrf.mxu3 }
  0xb7   : > { %v1091_v31 = vpack.c.bf16 %v1059_v29, %v1059_v29 }
  0xb8   : > { %v918_v33 = vpop.f32.mrf.mxu2  ;;  %v431_v35 = vpop.f32.mrf.mxu0 }
  0xb9   : > { %1124 = vst.msk [vmem:[%s1830_s10 + $0xc] sm:$0xf] %vm1120_vm2, %v1091_v31  ;;  %v992_v34 = vadd.f32 %v918_v33, %v655_v30  ;;  %v656_v36 = vpop.f32.mrf.mxu1 }
  0xba   : > { %v657_v40 = vadd.f32 %v656_v36, %v431_v35 }
  0xbb   : > { %v1028_v37 = vadd.f32 %v1823_v52, %v992_v34 }
  0xbd   : > { %v1060_v38 = vmax.f32 %v1028_v37, 0.0 }
  0xbe   : > { %v1868_v41 = vpop.f32.mrf.mxu3 }
  0xbf   : > { %v1092_v39 = vpack.c.bf16 %v1060_v38, %v1060_v38 }
  0xc0   : > { %v920_v42 = vpop.f32.mrf.mxu2  ;;  %v434_v46 = vpop.f32.mrf.mxu0 }
  0xc1   : > { %1125 = vst.msk [vmem:[%s1830_s10 + $0x10] sm:$0xf] %vm1120_vm2, %v1092_v39  ;;  %v993_v45 = vadd.f32 %v920_v42, %v657_v40  ;;  %v659_v49 = vpop.f32.mrf.mxu1 }
  0xc2   : > { %v660_v54 = vadd.f32 %v659_v49, %v434_v46 }
  0xc3   : > { %v1029_v50 = vadd.f32 %v1823_v52, %v993_v45  ;;  %1365 = vmatmul.msk.bf16.gmra.mxu0 %vm357_vm1, %v1603_v43  ;;  %1571 = vmatmul.msk.bf16.gmra.mxu3 %vm357_vm1, %v1624_v44 }
  0xc4   : > { %1449 = vmatmul.msk.bf16.gmra.mxu1 %vm357_vm1, %v1586_v47 }
  0xc5   : > { %v1061_v53 = vmax.f32 %v1029_v50, 0.0  ;;  %1567 = vmatmul.msk.bf16.gmra.mxu2 %vm357_vm1, %v1620_v48 }
  0xc6   : > { %v1881_v56 = vpop.f32.mrf.mxu3 }
  0xc7   : > { %v1093_v55 = vpack.c.bf16 %v1061_v53, %v1061_v53 }
  0xc8   : > { %v923_v57 = vpop.f32.mrf.mxu2  ;;  %v436_v59 = vpop.f32.mrf.mxu0 }
  0xc9   : > { %1126 = vst.msk [vmem:[%s1830_s10 + $0x14] sm:$0xf] %vm1120_vm2, %v1093_v55  ;;  %v994_v58 = vadd.f32 %v923_v57, %v660_v54  ;;  %v661_v60 = vpop.f32.mrf.mxu1 }
  0xca   : > { %v662_v1 = vadd.f32 %v661_v60, %v436_v59 }
  0xcb   : > { %v1030_v62 = vadd.f32 %v1823_v52, %v994_v58 }
  0xcd   : > { %v1062_v63 = vmax.f32 %v1030_v62, 0.0 }
  0xce   : > { %v1886_v2 = vpop.f32.mrf.mxu3 }
  0xcf   : > { %v1094_v0 = vpack.c.bf16 %v1062_v63, %v1062_v63 }
  0xd0   : > { %v925_v3 = vpop.f32.mrf.mxu2  ;;  %v439_v5 = vpop.f32.mrf.mxu0 }
  0xd1   : > { %1127 = vst.msk [vmem:[%s1830_s10 + $0x18] sm:$0xf] %vm1120_vm2, %v1094_v0  ;;  %v995_v4 = vadd.f32 %v925_v3, %v662_v1  ;;  %v664_v6 = vpop.f32.mrf.mxu1 }
  0xd2   : > { %v665_v9 = vadd.f32 %v664_v6, %v439_v5 }
  0xd3   : > { %v1031_v7 = vadd.f32 %v1823_v52, %v995_v4 }
  0xd5   : > { %v1063_v8 = vmax.f32 %v1031_v7, 0.0 }
  0xd6   : > { %v1891_v12 = vpop.f32.mrf.mxu3 }
  0xd7   : > { %v1095_v11 = vpack.c.bf16 %v1063_v8, %v1063_v8 }
  0xd8   : > { %v928_v13 = vpop.f32.mrf.mxu2  ;;  %v441_v15 = vpop.f32.mrf.mxu0 }
  0xd9   : > { %1128 = vst.msk [vmem:[%s1830_s10 + $0x1c] sm:$0xf] %vm1120_vm2, %v1095_v11  ;;  %v996_v14 = vadd.f32 %v928_v13, %v665_v9  ;;  %v666_v16 = vpop.f32.mrf.mxu1 }
  0xda   : > { %v667_v21 = vadd.f32 %v666_v16, %v441_v15 }
  0xdb   : > { %v1032_v17 = vadd.f32 %v1823_v52, %v996_v14 }
  0xdd   : > { %v1064_v18 = vmax.f32 %v1032_v17, 0.0 }
  0xde   : > { %v1896_v22 = vpop.f32.mrf.mxu3 }
  0xdf   : > { %v1096_v20 = vpack.c.bf16 %v1064_v18, %v1064_v18 }
  0xe0   : > { %v930_v23 = vpop.f32.mrf.mxu2  ;;  %v444_v25 = vpop.f32.mrf.mxu0 }
  0xe1   : > { %1129 = vst.msk [vmem:[%s1830_s10 + $0x20] sm:$0xf] %vm1120_vm2, %v1096_v20  ;;  %v997_v24 = vadd.f32 %v930_v23, %v667_v21  ;;  %v669_v26 = vpop.f32.mrf.mxu1 }
  0xe2   : > { %v670_v29 = vadd.f32 %v669_v26, %v444_v25 }
  0xe3   : > { %v1033_v27 = vadd.f32 %v1823_v52, %v997_v24 }
  0xe5   : > { %v1065_v28 = vmax.f32 %v1033_v27, 0.0 }
  0xe6   : > { %v1901_v31 = vpop.f32.mrf.mxu3 }
  0xe7   : > { %v1097_v30 = vpack.c.bf16 %v1065_v28, %v1065_v28 }
  0xe8   : > { %v933_v33 = vpop.f32.mrf.mxu2  ;;  %v446_v35 = vpop.f32.mrf.mxu0 }
  0xe9   : > { %1130 = vst.msk [vmem:[%s1830_s10 + $0x24] sm:$0xf] %vm1120_vm2, %v1097_v30  ;;  %v998_v34 = vadd.f32 %v933_v33, %v670_v29  ;;  %v671_v36 = vpop.f32.mrf.mxu1  ;;  %v705_v33 = vadd.f32 %v1891_v12, %v1818_v51  ;;  %v707_v51 = vadd.f32 %v1896_v22, %v1832_v61 }
  0xea   : > { %v672_v40 = vadd.f32 %v671_v36, %v446_v35 }
  0xeb   : > { %v1034_v37 = vadd.f32 %v1823_v52, %v998_v34 }
  0xed   : > { %v1066_v38 = vmax.f32 %v1034_v37, 0.0 }
  0xee   : > { %v1906_v42 = vpop.f32.mrf.mxu3 }
  0xef   : > { %v1098_v39 = vpack.c.bf16 %v1066_v38, %v1066_v38 }
  0xf0   : > { %v935_v43 = vpop.f32.mrf.mxu2  ;;  %v449_v45 = vpop.f32.mrf.mxu0 }
  0xf1   : > { %1131 = vst.msk [vmem:[%s1830_s10 + $0x28] sm:$0xf] %vm1120_vm2, %v1098_v39  ;;  %v999_v44 = vadd.f32 %v935_v43, %v672_v40  ;;  %v674_v46 = vpop.f32.mrf.mxu1 }
  0xf2   : > { %v675_v49 = vadd.f32 %v674_v46, %v449_v45 }
  0xf3   : > { %v1035_v47 = vadd.f32 %v1823_v52, %v999_v44 }
  0xf5   : > { %v1067_v48 = vmax.f32 %v1035_v47, 0.0 }
  0xf6   : > { %v1911_v53 = vpop.f32.mrf.mxu3 }
  0xf7   : > { %v1099_v50 = vpack.c.bf16 %v1067_v48, %v1067_v48 }
  0xf8   : > { %v938_v54 = vpop.f32.mrf.mxu2  ;;  %v451_v57 = vpop.f32.mrf.mxu0 }
  0xf9   : > { %1132 = vst.msk [vmem:[%s1830_s10 + $0x2c] sm:$0xf] %vm1120_vm2, %v1099_v50  ;;  %v1000_v55 = vadd.f32 %v938_v54, %v675_v49  ;;  %v676_v58 = vpop.f32.mrf.mxu1 }
  0xfa   : > { %v677_v63 = vadd.f32 %v676_v58, %v451_v57 }
  0xfb   : > { %v1036_v59 = vadd.f32 %v1823_v52, %v1000_v55 }
  0xfd   : > { %v1068_v60 = vmax.f32 %v1036_v59, 0.0 }
  0xfe   : > { %v1916_v0 = vpop.f32.mrf.mxu3 }
  0xff   : > { %v1100_v62 = vpack.c.bf16 %v1068_v60, %v1068_v60 }
 0x100   : > { %v940_v1 = vpop.f32.mrf.mxu2  ;;  %v454_v4 = vpop.f32.mrf.mxu0 }
 0x101   : > { %1133 = vst.msk [vmem:[%s1830_s10 + $0x30] sm:$0xf] %vm1120_vm2, %v1100_v62  ;;  %v1001_v3 = vadd.f32 %v940_v1, %v677_v63  ;;  %v679_v5 = vpop.f32.mrf.mxu1  ;;  %v710_v63 = vadd.f32 %v1901_v31, %v1845_v10  ;;  %v712_v31 = vadd.f32 %v1906_v42, %v1850_v19 }
 0x102   : > { %v680_v8 = vadd.f32 %v679_v5, %v454_v4 }
 0x103   : > { %v1037_v6 = vadd.f32 %v1823_v52, %v1001_v3 }
 0x105   : > { %v1069_v7 = vmax.f32 %v1037_v6, 0.0 }
 0x106   : > { %v1921_v11 = vpop.f32.mrf.mxu3 }
 0x107   : > { %v1101_v9 = vpack.c.bf16 %v1069_v7, %v1069_v7 }
 0x108   : > { %v943_v13 = vpop.f32.mrf.mxu2  ;;  %v456_v15 = vpop.f32.mrf.mxu0 }
 0x109   : > { %1134 = vst.msk [vmem:[%s1830_s10 + $0x34] sm:$0xf] %vm1120_vm2, %v1101_v9  ;;  %v1002_v14 = vadd.f32 %v943_v13, %v680_v8  ;;  %v681_v16 = vpop.f32.mrf.mxu1 }
 0x10a   : > { %v682_v21 = vadd.f32 %v681_v16, %v456_v15 }
 0x10b   : > { %v1038_v17 = vadd.f32 %v1823_v52, %v1002_v14 }
 0x10d   : > { %v1070_v18 = vmax.f32 %v1038_v17, 0.0 }
 0x10e   : > { %v1926_v23 = vpop.f32.mrf.mxu3 }
 0x10f   : > { %v1102_v20 = vpack.c.bf16 %v1070_v18, %v1070_v18 }
 0x110   : > { %v945_v24 = vpop.f32.mrf.mxu2  ;;  %v459_v26 = vpop.f32.mrf.mxu0 }
 0x111   : > { %1135 = vst.msk [vmem:[%s1830_s10 + $0x38] sm:$0xf] %vm1120_vm2, %v1102_v20  ;;  %v1003_v25 = vadd.f32 %v945_v24, %v682_v21  ;;  %v684_v27 = vpop.f32.mrf.mxu1 }
 0x112   : > { %v685_v30 = vadd.f32 %v684_v27, %v459_v26 }
 0x113   : > { %v1039_v28 = vadd.f32 %v1823_v52, %v1003_v25 }
 0x115   : > { %v1071_v29 = vmax.f32 %v1039_v28, 0.0 }
 0x116   : > { %v968_v35 = vpop.f32.mrf.mxu3 }
 0x117   : > { %v1103_v34 = vpack.c.bf16 %v1071_v29, %v1071_v29  ;;  %v1012_v37 = vadd.f32 %v968_v35, %v705_v33  ;;  %v715_v33 = vadd.f32 %v1911_v53, %v1863_v32  ;;  %v717_v53 = vadd.f32 %v1916_v0, %v1868_v41 }
 0x118   : > { %v948_v36 = vpop.f32.mrf.mxu2  ;;  %v461_v39 = vpop.f32.mrf.mxu0 }
 0x119   : > { %1136 = vst.msk [vmem:[%s1830_s10 + $0x3c] sm:$0xf] %vm1120_vm2, %v1103_v34  ;;  %v1004_v38 = vadd.f32 %v948_v36, %v685_v30  ;;  %v1048_v40 = vadd.f32 %v1823_v52, %v1012_v37  ;;  %v686_v43 = vpop.f32.mrf.mxu1 }
 0x11a   : > { %v687_v48 = vadd.f32 %v686_v43, %v461_v39 }
 0x11b   : > { %v1040_v44 = vadd.f32 %v1823_v52, %v1004_v38  ;;  %v1080_v45 = vmax.f32 %v1048_v40, 0.0 }
 0x11d   : > { %v1072_v46 = vmax.f32 %v1040_v44, 0.0  ;;  %v1112_v12 = vpack.c.bf16 %v1080_v45, %v1080_v45 }
 0x11e   : > { %v970_v49 = vpop.f32.mrf.mxu3 }
 0x11f   : > { %v1104_v47 = vpack.c.bf16 %v1072_v46, %v1072_v46  ;;  %1145 = vst.msk [vmem:[%s1830_s10 + $0x60] sm:$0xf] %vm1120_vm2, %v1112_v12  ;;  %v1013_v54 = vadd.f32 %v970_v49, %v707_v51 }
 0x120   : > { %v950_v50 = vpop.f32.mrf.mxu2  ;;  %v464_v57 = vpop.f32.mrf.mxu0 }
 0x121   : > { %1137 = vst.msk [vmem:[%s1830_s10 + $0x40] sm:$0xf] %vm1120_vm2, %v1104_v47  ;;  %v1005_v55 = vadd.f32 %v950_v50, %v687_v48  ;;  %v1049_v58 = vadd.f32 %v1823_v52, %v1013_v54  ;;  %v689_v59 = vpop.f32.mrf.mxu1 }
 0x122   : > { %v690_v62 = vadd.f32 %v689_v59, %v464_v57 }
 0x123   : > { %v1041_v60 = vadd.f32 %v1823_v52, %v1005_v55  ;;  %v1081_v61 = vmax.f32 %v1049_v58, 0.0 }
 0x125   : > { %v1073_v22 = vmax.f32 %v1041_v60, 0.0  ;;  %v1113_v1 = vpack.c.bf16 %v1081_v61, %v1081_v61  ;;  %v720_v61 = vadd.f32 %v1921_v11, %v1881_v56  ;;  %v722_v11 = vadd.f32 %v1926_v23, %v1886_v2 }
 0x126   : > { %v973_v4 = vpop.f32.mrf.mxu3 }
 0x127   : > { %v1105_v3 = vpack.c.bf16 %v1073_v22, %v1073_v22  ;;  %1146 = vst.msk [vmem:[%s1830_s10 + $0x64] sm:$0xf] %vm1120_vm2, %v1113_v1  ;;  %v1014_v6 = vadd.f32 %v973_v4, %v710_v63 }
 0x128   : > { %v953_v5 = vpop.f32.mrf.mxu2  ;;  %v466_v8 = vpop.f32.mrf.mxu0 }
 0x129   : > { %1138 = vst.msk [vmem:[%s1830_s10 + $0x44] sm:$0xf] %vm1120_vm2, %v1105_v3  ;;  %v1006_v7 = vadd.f32 %v953_v5, %v690_v62  ;;  %v1050_v9 = vadd.f32 %v1823_v52, %v1014_v6  ;;  %v691_v13 = vpop.f32.mrf.mxu1 }
 0x12a   : > { %v692_v18 = vadd.f32 %v691_v13, %v466_v8 }
 0x12b   : > { %v1042_v14 = vadd.f32 %v1823_v52, %v1006_v7  ;;  %v1082_v15 = vmax.f32 %v1050_v9, 0.0 }
 0x12d   : > { %v1074_v10 = vmax.f32 %v1042_v14, 0.0  ;;  %v1114_v16 = vpack.c.bf16 %v1082_v15, %v1082_v15 }
 0x12e   : > { %v975_v20 = vpop.f32.mrf.mxu3 }
 0x12f   : > { %v1106_v17 = vpack.c.bf16 %v1074_v10, %v1074_v10  ;;  %1147 = vst.msk [vmem:[%s1830_s10 + $0x68] sm:$0xf] %vm1120_vm2, %v1114_v16  ;;  %v1015_v24 = vadd.f32 %v975_v20, %v712_v31 }
 0x130   : > { %v955_v21 = vpop.f32.mrf.mxu2  ;;  %v469_v26 = vpop.f32.mrf.mxu0 }
 0x131   : > { %1139 = vst.msk [vmem:[%s1830_s10 + $0x48] sm:$0xf] %vm1120_vm2, %v1106_v17  ;;  %v1007_v25 = vadd.f32 %v955_v21, %v692_v18  ;;  %v1051_v27 = vadd.f32 %v1823_v52, %v1015_v24  ;;  %v694_v28 = vpop.f32.mrf.mxu1 }
 0x132   : > { %v695_v30 = vadd.f32 %v694_v28, %v469_v26 }
 0x133   : > { %v1043_v29 = vadd.f32 %v1823_v52, %v1007_v25  ;;  %v1083_v19 = vmax.f32 %v1051_v27, 0.0 }
 0x135   : > { %v1075_v42 = vmax.f32 %v1043_v29, 0.0  ;;  %v1115_v34 = vpack.c.bf16 %v1083_v19, %v1083_v19 }
 0x136   : > { %v978_v36 = vpop.f32.mrf.mxu3 }
 0x137   : > { %v1107_v35 = vpack.c.bf16 %v1075_v42, %v1075_v42  ;;  %1148 = vst.msk [vmem:[%s1830_s10 + $0x6c] sm:$0xf] %vm1120_vm2, %v1115_v34  ;;  %v1016_v38 = vadd.f32 %v978_v36, %v715_v33 }
 0x138   : > { %v958_v37 = vpop.f32.mrf.mxu2  ;;  %v471_v40 = vpop.f32.mrf.mxu0 }
 0x139   : > { %1140 = vst.msk [vmem:[%s1830_s10 + $0x4c] sm:$0xf] %vm1120_vm2, %v1107_v35  ;;  %v1008_v39 = vadd.f32 %v958_v37, %v695_v30  ;;  %v1052_v43 = vadd.f32 %v1823_v52, %v1016_v38  ;;  %v696_v44 = vpop.f32.mrf.mxu1 }
 0x13a   : > { %v697_v47 = vadd.f32 %v696_v44, %v471_v40 }
 0x13b   : > { %v1044_v45 = vadd.f32 %v1823_v52, %v1008_v39  ;;  %v1084_v46 = vmax.f32 %v1052_v43, 0.0 }
 0x13d   : > { %v1076_v32 = vmax.f32 %v1044_v45, 0.0  ;;  %v1116_v51 = vpack.c.bf16 %v1084_v46, %v1084_v46 }
 0x13e   : > { %v980_v48 = vpop.f32.mrf.mxu3 }
 0x13f   : > { %v1108_v12 = vpack.c.bf16 %v1076_v32, %v1076_v32  ;;  %1149 = vst.msk [vmem:[%s1830_s10 + $0x70] sm:$0xf] %vm1120_vm2, %v1116_v51  ;;  %v1017_v50 = vadd.f32 %v980_v48, %v717_v53 }
 0x140   : > { %v960_v49 = vpop.f32.mrf.mxu2  ;;  %v474_v57 = vpop.f32.mrf.mxu0 }
 0x141   : > { %1141 = vst.msk [vmem:[%s1830_s10 + $0x50] sm:$0xf] %vm1120_vm2, %v1108_v12  ;;  %v1009_v54 = vadd.f32 %v960_v49, %v697_v47  ;;  %v1053_v55 = vadd.f32 %v1823_v52, %v1017_v50  ;;  %v699_v58 = vpop.f32.mrf.mxu1 }
 0x142   : > { %v700_v60 = vadd.f32 %v699_v58, %v474_v57 }
 0x143   : > { %v1045_v59 = vadd.f32 %v1823_v52, %v1009_v54  ;;  %v1085_v41 = vmax.f32 %v1053_v55, 0.0 }
 0x145   : > { %v1077_v0 = vmax.f32 %v1045_v59, 0.0  ;;  %v1117_v22 = vpack.c.bf16 %v1085_v41, %v1085_v41 }
 0x146   : > { %v983_v63 = vpop.f32.mrf.mxu3 }
 0x147   : > { %v1109_v62 = vpack.c.bf16 %v1077_v0, %v1077_v0  ;;  %1150 = vst.msk [vmem:[%s1830_s10 + $0x74] sm:$0xf] %vm1120_vm2, %v1117_v22  ;;  %v1018_v3 = vadd.f32 %v983_v63, %v720_v61 }
 0x148   : > { %v963_v1 = vpop.f32.mrf.mxu2  ;;  %v476_v8 = vpop.f32.mrf.mxu0 }
 0x149   : > { %1142 = vst.msk [vmem:[%s1830_s10 + $0x54] sm:$0xf] %vm1120_vm2, %v1109_v62  ;;  %v1010_v4 = vadd.f32 %v963_v1, %v700_v60  ;;  %v1054_v5 = vadd.f32 %v1823_v52, %v1018_v3  ;;  %v701_v9 = vpop.f32.mrf.mxu1 }
 0x14a   : > { %v702_v15 = vadd.f32 %v701_v9, %v476_v8 }
 0x14b   : > { %v1046_v6 = vadd.f32 %v1823_v52, %v1010_v4  ;;  %v1086_v7 = vmax.f32 %v1054_v5, 0.0 }
 0x14d   : > { %v1078_v56 = vmax.f32 %v1046_v6, 0.0  ;;  %v1118_v13 = vpack.c.bf16 %v1086_v7, %v1086_v7 }
 0x14e   : > { %v985_v10 = vpop.f32.mrf.mxu3 }
 0x14f   : > { %v1110_v14 = vpack.c.bf16 %v1078_v56, %v1078_v56  ;;  %1151 = vst.msk [vmem:[%s1830_s10 + $0x78] sm:$0xf] %vm1120_vm2, %v1118_v13  ;;  %v1019_v16 = vadd.f32 %v985_v10, %v722_v11 }
 0x150   : > { %v965_v31 = vpop.f32.mrf.mxu2 }
 0x151   : > { %1143 = vst.msk [vmem:[%s1830_s10 + $0x58] sm:$0xf] %vm1120_vm2, %v1110_v14  ;;  %v1011_v17 = vadd.f32 %v965_v31, %v702_v15  ;;  %v1055_v18 = vadd.f32 %v1823_v52, %v1019_v16 }
 0x153   : > { %v1047_v20 = vadd.f32 %v1823_v52, %v1011_v17  ;;  %v1087_v21 = vmax.f32 %v1055_v18, 0.0 }
 0x155   : > { %v1079_v24 = vmax.f32 %v1047_v20, 0.0  ;;  %v1119_v2 = vpack.c.bf16 %v1087_v21, %v1087_v21 }
 0x157   : > { %v1111_v23 = vpack.c.bf16 %v1079_v24, %v1079_v24  ;;  %1152 = vst.msk [vmem:[%s1830_s10 + $0x7c] sm:$0xf] %vm1120_vm2, %v1119_v2 }
 0x159   : > { %1144 = vst.msk [vmem:[%s1830_s10 + $0x5c] sm:$0xf] %vm1120_vm2, %v1111_v23 }
 0x15a PF: > { %s13_s14 = sadd.s32 1, %s1677_s14   ;;  %s2010_s12 = smov %s1673_s13 }
 0x15b   : > { %p10_p5 = scmp.ge.s32.totalorder %s13_s14, 4   ;;  %s2011_s13 = smov %s2013_s15 }
 0x15d   :  { %12 = sbr.rel (!%p10_p5) target bundleno = 2 (0x2), region = 67 }

</bundles_post_ra>
